<compile_context>
chip_gen: v7x
topology: tpu7x:2x2x1
jax: 0.10.0
libtpu: 0.0.40
codegen_flags: <defaults>
</compile_context>

<pallas_src>
import jax
import jax.numpy as jnp
from jax.experimental import pallas as pl
from jax.experimental.pallas import tpu as pltpu


LEAKY_SLOPE = 0.2
BN_EPS = 0.8  # nn.BatchNorm1d(out_feat, 0.8) -> eps = 0.8


def _build_vec_layout():
    # Packed layout of all small per-layer vectors.  Every size is a multiple of
    # 128, so every offset is lane-aligned (static slices are free).
    sizes = [
        ("b1", 128),
        ("b2", 256), ("g2", 256), ("be2", 256),
        ("b3", 512), ("g3", 512), ("be3", 512),
        ("b4", 1024), ("g4", 1024), ("be4", 1024),
    ]
    layout, off = {}, 0
    for name, n in sizes:
        layout[name] = (off, n)
        off += n
    return layout, off


_VEC_LAYOUT, _VEC_FIXED = _build_vec_layout()  # fixed part = 5504 lanes; b5 (F_pad) appended


def _leaky_relu(x):
    # Exactly LeakyReLU(0.2) for slope < 1; one VPU max instead of compare+select.
    return jnp.maximum(x, LEAKY_SLOPE * x)


def generator_kernel(x_ref, w1_ref, w2_ref, w3_ref, w4_hbm, w5_hbm, vec_ref,
                     o_ref, w4_buf, w5_buf, dma_sem):
    """Whole MLP in VMEM, single grid point (full-batch BatchNorm statistics)."""
    F_pad = o_ref.shape[1]

    # Start the big late-layer weight DMAs now; they overlap layers 1-3 compute.
    cp4 = pltpu.make_async_copy(w4_hbm, w4_buf, dma_sem.at[0])
    cp5 = pltpu.make_async_copy(w5_hbm, w5_buf, dma_sem.at[1])
    cp4.start()
    cp5.start()

    def vec(name):
        off, n = _VEC_LAYOUT[name]
        return vec_ref[:, off:off + n]          # (1, n), static lane-aligned slice

    def mm(h, w):
        # bf16 operands on the MXU, f32 accumulation.
        return jnp.dot(h.astype(jnp.bfloat16), w, preferred_element_type=jnp.float32)

    def bn_leaky(z, g, be):
        # Fused single-pass BatchNorm (training-mode, biased variance):
        # one reduction pass + one FMA pass.
        inv_b = 1.0 / z.shape[0]
        s1 = jnp.sum(z, axis=0, keepdims=True)
        s2 = jnp.sum(z * z, axis=0, keepdims=True)
        mu = s1 * inv_b
        var = jnp.maximum(s2 * inv_b - mu * mu, 0.0)   # clamp f32 cancellation
        scale = g * jax.lax.rsqrt(var + BN_EPS)
        shift = be - mu * scale
        return _leaky_relu(z * scale + shift)

    # block(F, 128, normalize=False): Linear + LeakyReLU (x already bf16).
    h = _leaky_relu(
        jnp.dot(x_ref[...], w1_ref[...], preferred_element_type=jnp.float32)
        + vec("b1"))

    # block(128,256) / block(256,512): Linear + BN + LeakyReLU (weights resident).
    h = bn_leaky(mm(h, w2_ref[...]) + vec("b2"), vec("g2"), vec("be2"))
    h = bn_leaky(mm(h, w3_ref[...]) + vec("b3"), vec("g3"), vec("be3"))

    # block(512,1024): wait for the prefetched w4 only now.
    cp4.wait()
    h = bn_leaky(mm(h, w4_buf[...]) + vec("b4"), vec("g4"), vec("be4"))

    # Final Linear (lane-dense, padded to F_pad) + exact sigmoid via one EUP tanh.
    cp5.wait()
    b5 = vec_ref[:, _VEC_FIXED:_VEC_FIXED + F_pad]
    z = mm(h, w5_buf[...]) + b5
    o_ref[...] = 0.5 * jnp.tanh(0.5 * z) + 0.5


def init_generator_params(key, feature_dim):
    """Deterministic synthetic parameters (PyTorch Linear init, stored (in,out))."""
    dims = [feature_dim, 128, 256, 512, 1024, feature_dim]
    params = {}
    for i in range(5):
        key, kw, kb = jax.random.split(key, 3)
        bound = 1.0 / float(dims[i]) ** 0.5
        w = jax.random.uniform(kw, (dims[i], dims[i + 1]), jnp.float32, -bound, bound)
        b = jax.random.uniform(kb, (1, dims[i + 1]), jnp.float32, -bound, bound)
        params[f"w{i + 1}"] = w.astype(jnp.bfloat16)  # bf16 weights: half the DMA
        params[f"b{i + 1}"] = b                       # bias / BN params stay f32
    for i, c in zip((2, 3, 4), (256, 512, 1024)):
        params[f"g{i}"] = jnp.ones((1, c), jnp.float32)    # BN gamma
        params[f"be{i}"] = jnp.zeros((1, c), jnp.float32)  # BN beta
    return params


def prepare_generator_params(params, l_shape, dict_shape):
    """One-time packing/padding so nothing is rebuilt in the per-call forward path."""
    F = l_shape * dict_shape
    F_pad = max(128, ((F + 127) // 128) * 128)     # lane-dense final layer / output

    # Pack all small per-layer vectors + padded b5 into one (1, 5504 + F_pad) array.
    b5p = jnp.zeros((1, F_pad), jnp.float32).at[:, :F].set(params["b5"])
    vec = jnp.concatenate(
        [params[name].astype(jnp.float32) for name in _VEC_LAYOUT] + [b5p], axis=1)

    # Zero-pad the final weight to F_pad lanes; padded cols sliced off post-kernel.
    w5p = jnp.zeros((1024, F_pad), jnp.bfloat16).at[:, :F].set(params["w5"])

    return {
        "w1": params["w1"], "w2": params["w2"], "w3": params["w3"],
        "w4": params["w4"], "w5p": w5p, "vec": vec,
        "F": F, "F_pad": F_pad,
    }


def generator_forward(x, prepped, l_shape, dict_shape):
    B = x.shape[0]
    F, F_pad = prepped["F"], prepped["F_pad"]

    # bf16 input activations: half the input DMA bytes (matmul operands are bf16 anyway).
    data = x.reshape(B, F).astype(jnp.bfloat16)

    vmem = pl.BlockSpec(memory_space=pltpu.MemorySpace.VMEM)
    hbm = pl.BlockSpec(memory_space=pl.ANY)   # w4/w5 stay in HBM, prefetched in-kernel

    out = pl.pallas_call(
        generator_kernel,
        out_shape=jax.ShapeDtypeStruct((B, F_pad), jnp.float32),
        in_specs=[vmem, vmem, vmem, vmem, hbm, hbm, vmem],
        out_specs=vmem,
        scratch_shapes=[
            pltpu.VMEM((512, 1024), jnp.bfloat16),    # w4 prefetch buffer (~1 MiB)
            pltpu.VMEM((1024, F_pad), jnp.bfloat16),  # w5 prefetch buffer
            pltpu.SemaphoreType.DMA((2,)),
        ],
        compiler_params=pltpu.CompilerParams(vmem_limit_bytes=32 << 20),
    )(data, prepped["w1"], prepped["w2"], prepped["w3"], prepped["w4"],
      prepped["w5p"], prepped["vec"])

    return out[:, :F].reshape(-1, l_shape, dict_shape)


def generator_reference(x, params, l_shape, dict_shape):
    """Pure-JAX reference with matching numerics (bf16 matmul operands, f32 acc)."""
    B = x.shape[0]

    def mm(h, w):
        return jnp.dot(h.astype(jnp.bfloat16), w, preferred_element_type=jnp.float32)

    h = x.reshape(B, -1).astype(jnp.float32)
    h = _leaky_relu(mm(h, params["w1"]) + params["b1"])
    for i in (2, 3, 4):
        z = mm(h, params[f"w{i}"]) + params[f"b{i}"]
        mu = jnp.mean(z, axis=0, keepdims=True)
        var = jnp.mean((z - mu) ** 2, axis=0, keepdims=True)
        zn = (z - mu) / jnp.sqrt(var + BN_EPS) * params[f"g{i}"] + params[f"be{i}"]
        h = _leaky_relu(zn)
    z = mm(h, params["w5"]) + params["b5"]
    return jax.nn.sigmoid(z).reshape(-1, l_shape, dict_shape)


if __name__ == "__main__":
    l_shape, dict_shape = 4, 16          # feature_dims = (4, 16) -> F = 64
    batch = 8                            # BatchNorm needs batch > 1
    feature_dim = l_shape * dict_shape

    key = jax.random.PRNGKey(0)
    key, kx = jax.random.split(key)
    x = jax.random.normal(kx, (batch, l_shape, dict_shape), jnp.float32)

    params = init_generator_params(key, feature_dim)
    prepped = prepare_generator_params(params, l_shape, dict_shape)   # one-time packing

    out = jax.block_until_ready(generator_forward(x, prepped, l_shape, dict_shape))
    ref = generator_reference(x, params, l_shape, dict_shape)

    assert out.shape == (batch, l_shape, dict_shape), out.shape
    max_err = float(jnp.max(jnp.abs(out - ref)))
    assert max_err < 2e-3, f"max abs err {max_err}"

    print("KERNEL_OK")
</pallas_src>

<mosaic_0001>
module attributes {stable_mosaic.version = 11 : i64} {
  func.func @generator_kernel(%arg0: memref<8x64xbf16, #tpu.memory_space<vmem>>, %arg1: memref<64x128xbf16, #tpu.memory_space<vmem>>, %arg2: memref<128x256xbf16, #tpu.memory_space<vmem>>, %arg3: memref<256x512xbf16, #tpu.memory_space<vmem>>, %arg4: memref<512x1024xbf16, #tpu.memory_space<any>>, %arg5: memref<1024x128xbf16, #tpu.memory_space<any>>, %arg6: memref<1x5632xf32, #tpu.memory_space<vmem>>, %arg7: memref<8x128xf32, #tpu.memory_space<vmem>>, %arg8: memref<512x1024xbf16, #tpu.memory_space<vmem>>, %arg9: memref<1024x128xbf16, #tpu.memory_space<vmem>>, %arg10: memref<2x!tpu.dma_semaphore, #tpu.memory_space<semaphore_mem>>) attributes {dimension_semantics = [], scalar_prefetch = 0 : i64, scratch_operands = 3 : i64, tpu.core_type = #tpu.core_type<tc>} {
    %c0_i32 = arith.constant 0 : i32
    %0 = tpu.memref_slice %arg10[%c0_i32] : memref<2x!tpu.dma_semaphore, #tpu.memory_space<semaphore_mem>> -> memref<1x!tpu.dma_semaphore, #tpu.memory_space<semaphore_mem>>
    %1 = tpu.memref_squeeze %0 : memref<1x!tpu.dma_semaphore, #tpu.memory_space<semaphore_mem>> -> memref<!tpu.dma_semaphore, #tpu.memory_space<semaphore_mem>>
    tpu.enqueue_dma source(%arg4 : memref<512x1024xbf16, #tpu.memory_space<any>>) target(%arg8 : memref<512x1024xbf16, #tpu.memory_space<vmem>>) target_semaphore(%1 : memref<!tpu.dma_semaphore, #tpu.memory_space<semaphore_mem>>)
    %c1_i32 = arith.constant 1 : i32
    %2 = tpu.memref_slice %arg10[%c1_i32] : memref<2x!tpu.dma_semaphore, #tpu.memory_space<semaphore_mem>> -> memref<1x!tpu.dma_semaphore, #tpu.memory_space<semaphore_mem>>
    %3 = tpu.memref_squeeze %2 : memref<1x!tpu.dma_semaphore, #tpu.memory_space<semaphore_mem>> -> memref<!tpu.dma_semaphore, #tpu.memory_space<semaphore_mem>>
    tpu.enqueue_dma source(%arg5 : memref<1024x128xbf16, #tpu.memory_space<any>>) target(%arg9 : memref<1024x128xbf16, #tpu.memory_space<vmem>>) target_semaphore(%3 : memref<!tpu.dma_semaphore, #tpu.memory_space<semaphore_mem>>)
    %c0 = arith.constant 0 : index
    %c0_0 = arith.constant 0 : index
    %4 = vector.load %arg0[%c0, %c0_0] : memref<8x64xbf16, #tpu.memory_space<vmem>>, vector<8x64xbf16>
    %c0_1 = arith.constant 0 : index
    %c0_2 = arith.constant 0 : index
    %5 = vector.load %arg1[%c0_1, %c0_2] : memref<64x128xbf16, #tpu.memory_space<vmem>>, vector<64x128xbf16>
    %cst = arith.constant dense<0.000000e+00> : vector<8x128xf32>
    %6 = tpu.matmul %4, %5, %cst {dimension_numbers = #tpu.dot_dimension_numbers<[1], [0], [0], [1], [0, 0, 1, 1], [], []>} : vector<8x64xbf16>, vector<64x128xbf16>, vector<8x128xf32> -> vector<8x128xf32>
    %c0_3 = arith.constant 0 : index
    %c0_4 = arith.constant 0 : index
    %7 = vector.load %arg6[%c0_3, %c0_4] : memref<1x5632xf32, #tpu.memory_space<vmem>>, vector<1x128xf32>
    %8 = vector.broadcast %7 : vector<1x128xf32> to vector<8x128xf32>
    %9 = arith.addf %6, %8 : vector<8x128xf32>
    %cst_5 = arith.constant 2.000000e-01 : f32
    %10 = vector.broadcast %cst_5 : f32 to vector<8x128xf32>
    %11 = arith.mulf %10, %9 : vector<8x128xf32>
    %12 = arith.maximumf %9, %11 : vector<8x128xf32>
    %c0_6 = arith.constant 0 : index
    %c0_7 = arith.constant 0 : index
    %13 = vector.load %arg2[%c0_6, %c0_7] : memref<128x256xbf16, #tpu.memory_space<vmem>>, vector<128x256xbf16>
    %14 = arith.truncf %12 : vector<8x128xf32> to vector<8x128xbf16>
    %cst_8 = arith.constant dense<0.000000e+00> : vector<8x256xf32>
    %15 = tpu.matmul %14, %13, %cst_8 {dimension_numbers = #tpu.dot_dimension_numbers<[1], [0], [0], [1], [0, 0, 1, 1], [], []>} : vector<8x128xbf16>, vector<128x256xbf16>, vector<8x256xf32> -> vector<8x256xf32>
    %c0_9 = arith.constant 0 : index
    %c128 = arith.constant 128 : index
    %16 = vector.load %arg6[%c0_9, %c128] : memref<1x5632xf32, #tpu.memory_space<vmem>>, vector<1x256xf32>
    %17 = vector.broadcast %16 : vector<1x256xf32> to vector<8x256xf32>
    %18 = arith.addf %15, %17 : vector<8x256xf32>
    %c0_10 = arith.constant 0 : index
    %c384 = arith.constant 384 : index
    %19 = vector.load %arg6[%c0_10, %c384] : memref<1x5632xf32, #tpu.memory_space<vmem>>, vector<1x256xf32>
    %c0_11 = arith.constant 0 : index
    %c640 = arith.constant 640 : index
    %20 = vector.load %arg6[%c0_11, %c640] : memref<1x5632xf32, #tpu.memory_space<vmem>>, vector<1x256xf32>
    %cst_12 = arith.constant dense<0.000000e+00> : vector<256xf32>
    %21 = vector.multi_reduction <add>, %18, %cst_12 [0] : vector<8x256xf32> to vector<256xf32>
    %22 = vector.shape_cast %21 : vector<256xf32> to vector<1x256xf32>
    %23 = arith.mulf %18, %18 : vector<8x256xf32>
    %cst_13 = arith.constant dense<0.000000e+00> : vector<256xf32>
    %24 = vector.multi_reduction <add>, %23, %cst_13 [0] : vector<8x256xf32> to vector<256xf32>
    %25 = vector.shape_cast %24 : vector<256xf32> to vector<1x256xf32>
    %cst_14 = arith.constant 1.250000e-01 : f32
    %26 = vector.broadcast %cst_14 : f32 to vector<1x256xf32>
    %27 = arith.mulf %22, %26 : vector<1x256xf32>
    %cst_15 = arith.constant 1.250000e-01 : f32
    %28 = vector.broadcast %cst_15 : f32 to vector<1x256xf32>
    %29 = arith.mulf %25, %28 : vector<1x256xf32>
    %30 = arith.mulf %27, %27 : vector<1x256xf32>
    %31 = arith.subf %29, %30 : vector<1x256xf32>
    %cst_16 = arith.constant 0.000000e+00 : f32
    %32 = vector.broadcast %cst_16 : f32 to vector<1x256xf32>
    %33 = arith.maximumf %31, %32 : vector<1x256xf32>
    %cst_17 = arith.constant 8.000000e-01 : f32
    %34 = vector.broadcast %cst_17 : f32 to vector<1x256xf32>
    %35 = arith.addf %33, %34 : vector<1x256xf32>
    %36 = math.rsqrt %35 : vector<1x256xf32>
    %37 = arith.mulf %19, %36 : vector<1x256xf32>
    %38 = arith.mulf %27, %37 : vector<1x256xf32>
    %39 = arith.subf %20, %38 : vector<1x256xf32>
    %40 = vector.broadcast %37 : vector<1x256xf32> to vector<8x256xf32>
    %41 = arith.mulf %18, %40 : vector<8x256xf32>
    %42 = vector.broadcast %39 : vector<1x256xf32> to vector<8x256xf32>
    %43 = arith.addf %41, %42 : vector<8x256xf32>
    %cst_18 = arith.constant 2.000000e-01 : f32
    %44 = vector.broadcast %cst_18 : f32 to vector<8x256xf32>
    %45 = arith.mulf %44, %43 : vector<8x256xf32>
    %46 = arith.maximumf %43, %45 : vector<8x256xf32>
    %c0_19 = arith.constant 0 : index
    %c0_20 = arith.constant 0 : index
    %47 = vector.load %arg3[%c0_19, %c0_20] : memref<256x512xbf16, #tpu.memory_space<vmem>>, vector<256x512xbf16>
    %48 = arith.truncf %46 : vector<8x256xf32> to vector<8x256xbf16>
    %cst_21 = arith.constant dense<0.000000e+00> : vector<8x512xf32>
    %49 = tpu.matmul %48, %47, %cst_21 {dimension_numbers = #tpu.dot_dimension_numbers<[1], [0], [0], [1], [0, 0, 1, 1], [], []>} : vector<8x256xbf16>, vector<256x512xbf16>, vector<8x512xf32> -> vector<8x512xf32>
    %c0_22 = arith.constant 0 : index
    %c896 = arith.constant 896 : index
    %50 = vector.load %arg6[%c0_22, %c896] : memref<1x5632xf32, #tpu.memory_space<vmem>>, vector<1x512xf32>
    %51 = vector.broadcast %50 : vector<1x512xf32> to vector<8x512xf32>
    %52 = arith.addf %49, %51 : vector<8x512xf32>
    %c0_23 = arith.constant 0 : index
    %c1408 = arith.constant 1408 : index
    %53 = vector.load %arg6[%c0_23, %c1408] : memref<1x5632xf32, #tpu.memory_space<vmem>>, vector<1x512xf32>
    %c0_24 = arith.constant 0 : index
    %c1920 = arith.constant 1920 : index
    %54 = vector.load %arg6[%c0_24, %c1920] : memref<1x5632xf32, #tpu.memory_space<vmem>>, vector<1x512xf32>
    %cst_25 = arith.constant dense<0.000000e+00> : vector<512xf32>
    %55 = vector.multi_reduction <add>, %52, %cst_25 [0] : vector<8x512xf32> to vector<512xf32>
    %56 = vector.shape_cast %55 : vector<512xf32> to vector<1x512xf32>
    %57 = arith.mulf %52, %52 : vector<8x512xf32>
    %cst_26 = arith.constant dense<0.000000e+00> : vector<512xf32>
    %58 = vector.multi_reduction <add>, %57, %cst_26 [0] : vector<8x512xf32> to vector<512xf32>
    %59 = vector.shape_cast %58 : vector<512xf32> to vector<1x512xf32>
    %cst_27 = arith.constant 1.250000e-01 : f32
    %60 = vector.broadcast %cst_27 : f32 to vector<1x512xf32>
    %61 = arith.mulf %56, %60 : vector<1x512xf32>
    %cst_28 = arith.constant 1.250000e-01 : f32
    %62 = vector.broadcast %cst_28 : f32 to vector<1x512xf32>
    %63 = arith.mulf %59, %62 : vector<1x512xf32>
    %64 = arith.mulf %61, %61 : vector<1x512xf32>
    %65 = arith.subf %63, %64 : vector<1x512xf32>
    %cst_29 = arith.constant 0.000000e+00 : f32
    %66 = vector.broadcast %cst_29 : f32 to vector<1x512xf32>
    %67 = arith.maximumf %65, %66 : vector<1x512xf32>
    %cst_30 = arith.constant 8.000000e-01 : f32
    %68 = vector.broadcast %cst_30 : f32 to vector<1x512xf32>
    %69 = arith.addf %67, %68 : vector<1x512xf32>
    %70 = math.rsqrt %69 : vector<1x512xf32>
    %71 = arith.mulf %53, %70 : vector<1x512xf32>
    %72 = arith.mulf %61, %71 : vector<1x512xf32>
    %73 = arith.subf %54, %72 : vector<1x512xf32>
    %74 = vector.broadcast %71 : vector<1x512xf32> to vector<8x512xf32>
    %75 = arith.mulf %52, %74 : vector<8x512xf32>
    %76 = vector.broadcast %73 : vector<1x512xf32> to vector<8x512xf32>
    %77 = arith.addf %75, %76 : vector<8x512xf32>
    %cst_31 = arith.constant 2.000000e-01 : f32
    %78 = vector.broadcast %cst_31 : f32 to vector<8x512xf32>
    %79 = arith.mulf %78, %77 : vector<8x512xf32>
    %80 = arith.maximumf %77, %79 : vector<8x512xf32>
    %c0_i32_32 = arith.constant 0 : i32
    %81 = tpu.memref_slice %arg10[%c0_i32_32] : memref<2x!tpu.dma_semaphore, #tpu.memory_space<semaphore_mem>> -> memref<1x!tpu.dma_semaphore, #tpu.memory_space<semaphore_mem>>
    %82 = tpu.memref_squeeze %81 : memref<1x!tpu.dma_semaphore, #tpu.memory_space<semaphore_mem>> -> memref<!tpu.dma_semaphore, #tpu.memory_space<semaphore_mem>>
    tpu.wait_dma2 semaphore(%82 : memref<!tpu.dma_semaphore, #tpu.memory_space<semaphore_mem>>) src(%arg4 : memref<512x1024xbf16, #tpu.memory_space<any>>) dst(%arg8 : memref<512x1024xbf16, #tpu.memory_space<vmem>>)
    %c0_33 = arith.constant 0 : index
    %c0_34 = arith.constant 0 : index
    %83 = vector.load %arg8[%c0_33, %c0_34] : memref<512x1024xbf16, #tpu.memory_space<vmem>>, vector<512x1024xbf16>
    %84 = arith.truncf %80 : vector<8x512xf32> to vector<8x512xbf16>
    %cst_35 = arith.constant dense<0.000000e+00> : vector<8x1024xf32>
    %85 = tpu.matmul %84, %83, %cst_35 {dimension_numbers = #tpu.dot_dimension_numbers<[1], [0], [0], [1], [0, 0, 1, 1], [], []>} : vector<8x512xbf16>, vector<512x1024xbf16>, vector<8x1024xf32> -> vector<8x1024xf32>
    %c0_36 = arith.constant 0 : index
    %c2432 = arith.constant 2432 : index
    %86 = vector.load %arg6[%c0_36, %c2432] : memref<1x5632xf32, #tpu.memory_space<vmem>>, vector<1x1024xf32>
    %87 = vector.broadcast %86 : vector<1x1024xf32> to vector<8x1024xf32>
    %88 = arith.addf %85, %87 : vector<8x1024xf32>
    %c0_37 = arith.constant 0 : index
    %c3456 = arith.constant 3456 : index
    %89 = vector.load %arg6[%c0_37, %c3456] : memref<1x5632xf32, #tpu.memory_space<vmem>>, vector<1x1024xf32>
    %c0_38 = arith.constant 0 : index
    %c4480 = arith.constant 4480 : index
    %90 = vector.load %arg6[%c0_38, %c4480] : memref<1x5632xf32, #tpu.memory_space<vmem>>, vector<1x1024xf32>
    %cst_39 = arith.constant dense<0.000000e+00> : vector<1024xf32>
    %91 = vector.multi_reduction <add>, %88, %cst_39 [0] : vector<8x1024xf32> to vector<1024xf32>
    %92 = vector.shape_cast %91 : vector<1024xf32> to vector<1x1024xf32>
    %93 = arith.mulf %88, %88 : vector<8x1024xf32>
    %cst_40 = arith.constant dense<0.000000e+00> : vector<1024xf32>
    %94 = vector.multi_reduction <add>, %93, %cst_40 [0] : vector<8x1024xf32> to vector<1024xf32>
    %95 = vector.shape_cast %94 : vector<1024xf32> to vector<1x1024xf32>
    %cst_41 = arith.constant 1.250000e-01 : f32
    %96 = vector.broadcast %cst_41 : f32 to vector<1x1024xf32>
    %97 = arith.mulf %92, %96 : vector<1x1024xf32>
    %cst_42 = arith.constant 1.250000e-01 : f32
    %98 = vector.broadcast %cst_42 : f32 to vector<1x1024xf32>
    %99 = arith.mulf %95, %98 : vector<1x1024xf32>
    %100 = arith.mulf %97, %97 : vector<1x1024xf32>
    %101 = arith.subf %99, %100 : vector<1x1024xf32>
    %cst_43 = arith.constant 0.000000e+00 : f32
    %102 = vector.broadcast %cst_43 : f32 to vector<1x1024xf32>
    %103 = arith.maximumf %101, %102 : vector<1x1024xf32>
    %cst_44 = arith.constant 8.000000e-01 : f32
    %104 = vector.broadcast %cst_44 : f32 to vector<1x1024xf32>
    %105 = arith.addf %103, %104 : vector<1x1024xf32>
    %106 = math.rsqrt %105 : vector<1x1024xf32>
    %107 = arith.mulf %89, %106 : vector<1x1024xf32>
    %108 = arith.mulf %97, %107 : vector<1x1024xf32>
    %109 = arith.subf %90, %108 : vector<1x1024xf32>
    %110 = vector.broadcast %107 : vector<1x1024xf32> to vector<8x1024xf32>
    %111 = arith.mulf %88, %110 : vector<8x1024xf32>
    %112 = vector.broadcast %109 : vector<1x1024xf32> to vector<8x1024xf32>
    %113 = arith.addf %111, %112 : vector<8x1024xf32>
    %cst_45 = arith.constant 2.000000e-01 : f32
    %114 = vector.broadcast %cst_45 : f32 to vector<8x1024xf32>
    %115 = arith.mulf %114, %113 : vector<8x1024xf32>
    %116 = arith.maximumf %113, %115 : vector<8x1024xf32>
    %c1_i32_46 = arith.constant 1 : i32
    %117 = tpu.memref_slice %arg10[%c1_i32_46] : memref<2x!tpu.dma_semaphore, #tpu.memory_space<semaphore_mem>> -> memref<1x!tpu.dma_semaphore, #tpu.memory_space<semaphore_mem>>
    %118 = tpu.memref_squeeze %117 : memref<1x!tpu.dma_semaphore, #tpu.memory_space<semaphore_mem>> -> memref<!tpu.dma_semaphore, #tpu.memory_space<semaphore_mem>>
    tpu.wait_dma2 semaphore(%118 : memref<!tpu.dma_semaphore, #tpu.memory_space<semaphore_mem>>) src(%arg5 : memref<1024x128xbf16, #tpu.memory_space<any>>) dst(%arg9 : memref<1024x128xbf16, #tpu.memory_space<vmem>>)
    %c0_47 = arith.constant 0 : index
    %c5504 = arith.constant 5504 : index
    %119 = vector.load %arg6[%c0_47, %c5504] : memref<1x5632xf32, #tpu.memory_space<vmem>>, vector<1x128xf32>
    %c0_48 = arith.constant 0 : index
    %c0_49 = arith.constant 0 : index
    %120 = vector.load %arg9[%c0_48, %c0_49] : memref<1024x128xbf16, #tpu.memory_space<vmem>>, vector<1024x128xbf16>
    %121 = arith.truncf %116 : vector<8x1024xf32> to vector<8x1024xbf16>
    %cst_50 = arith.constant dense<0.000000e+00> : vector<8x128xf32>
    %122 = tpu.matmul %121, %120, %cst_50 {dimension_numbers = #tpu.dot_dimension_numbers<[1], [0], [0], [1], [0, 0, 1, 1], [], []>} : vector<8x1024xbf16>, vector<1024x128xbf16>, vector<8x128xf32> -> vector<8x128xf32>
    %123 = vector.broadcast %119 : vector<1x128xf32> to vector<8x128xf32>
    %124 = arith.addf %122, %123 : vector<8x128xf32>
    %cst_51 = arith.constant 5.000000e-01 : f32
    %125 = vector.broadcast %cst_51 : f32 to vector<8x128xf32>
    %126 = arith.mulf %125, %124 : vector<8x128xf32>
    %127 = math.tanh %126 : vector<8x128xf32>
    %cst_52 = arith.constant 5.000000e-01 : f32
    %128 = vector.broadcast %cst_52 : f32 to vector<8x128xf32>
    %129 = arith.mulf %128, %127 : vector<8x128xf32>
    %cst_53 = arith.constant 5.000000e-01 : f32
    %130 = vector.broadcast %cst_53 : f32 to vector<8x128xf32>
    %131 = arith.addf %129, %130 : vector<8x128xf32>
    %c0_54 = arith.constant 0 : index
    %c0_55 = arith.constant 0 : index
    %132 = vector.load %arg7[%c0_54, %c0_55] : memref<8x128xf32, #tpu.memory_space<vmem>>, vector<8x128xf32>
    tpu.vector_store %arg7[%c0_54, %c0_55], %131 {strides = array<i32>} : memref<8x128xf32, #tpu.memory_space<vmem>>, vector<8x128xf32>,
    return
  }
}

</mosaic_0001>

<bundles_post_ra>
// kernel: tpu_custom_call.1
= control target key start
LH: loop header
LB: loop body
LE: loop exit
PB: predicated region body
PF: predicated region fallthrough
CT: control target
= control target key end

     0   :  { %12 = vsyncpa [#allocation6], 0  ;;  %s3498_s0 = inlined_call_operand.hbm [shape: bf16[8,64], index: 0, kind: input, shape index: {}]   ;;  %s3499_s1 = inlined_call_operand.hbm [shape: bf16[64,128], index: 1, kind: input, shape index: {}]   ;;  %s3500_s2 = inlined_call_operand.hbm [shape: bf16[128,256], index: 2, kind: input, shape index: {}]   ;;  %s3501_s3 = inlined_call_operand.hbm [shape: bf16[256,512], index: 3, kind: input, shape index: {}]   ;;  %s3502_s4 = inlined_call_operand.hbm [shape: bf16[512,1024], index: 4, kind: input, shape index: {}]   ;;  %s3503_s5 = inlined_call_operand.hbm [shape: bf16[1024,128], index: 5, kind: input, shape index: {}]   ;;  %s3504_s6 = inlined_call_operand.hbm [shape: f32[1,5632], index: 6, kind: input, shape index: {}]   ;;  %s3505_s7 = inlined_call_operand.hbm [shape: f32[8,128], index: 7, kind: output, shape index: {}]  }
   0x1   :  { %13 = vsyncpa [#allocation9], 0 }
   0x2   :  { %14 = vsyncpa [#allocation12], 0 }
   0x3   :  { %15 = vsyncpa [#allocation7], 0  ;;  %s3054_s24 = smov [#allocation8]   ;;  %s2888_s28 = scalar_lea.hbm %s3499_s1, 512 }
   0x4   :  { %s31_s25 = sshll.u32 %s3054_s24, 4  ;;  %p2889_p0 = scmp.ne.s32.totalorder %s3499_s1, %s2888_s28  ;;  %s32_s25 = int_to_ptr.vmem [resolvable:$true] %s31_s25 }
   0x5   :  { %p2892_p1 = scmp.lt.u32.totalorder %s2888_s28, %s3499_s1 }
   0x7   :  { %p2894_p2 = pnand %p2892_p1, %p2889_p0 }
   0x9   :  { %2897 = shalt.err (!%p2894_p2)
}
   0xa   :  { %s2898_s10 = scalar_lea.vmem %s32_s25, 512  ;;  %p2903_p4 = scmp.lt.s32.totalorder %s32_s25, %s32_s25 }
   0xb   :  { %p2899_p3 = scmp.ne.s32.totalorder %s32_s25, %s2898_s10  ;;  %p2904_p5 = scmp.lt.s32.totalorder %s2898_s10, %s2898_s10 }
   0xd   :  { %p2905_p6 = por %p2904_p5, %p2903_p4 }
   0xf   :  { %p2906_p7 = pnand %p2905_p6, %p2899_p3 }
  0x11   :  { %2909 = shalt.err (!%p2906_p7)
}
  0x12   :  { %s3055_s11 = smov 64   ;;  %s3056_s12 = smov 4  }
  0x13   :  { %37 = dma.hbm_to_vmem [thread:$0]  %s3499_s1, 512, %s32_s25, [#allocation9], %s3055_s11, %s3055_s11, %s3056_s12  }
  0x14   :  { %s3057_s15 = smov [#allocation11]   ;;  %s2910_s19 = scalar_lea.hbm %s3501_s3, 8192 }
  0x15   :  { %s55_s16 = sshll.u32 %s3057_s15, 4  ;;  %p2911_p8 = scmp.ne.s32.totalorder %s3501_s3, %s2910_s19  ;;  %s56_s16 = int_to_ptr.vmem [resolvable:$true] %s55_s16 }
  0x16   :  { %p2914_p9 = scmp.lt.u32.totalorder %s2910_s19, %s3501_s3 }
  0x18   :  { %p2916_p10 = pnand %p2914_p9, %p2911_p8 }
  0x1a   :  { %2919 = shalt.err (!%p2916_p10)
}
  0x1b   :  { %s2920_s24 = scalar_lea.vmem %s56_s16, 8192  ;;  %p2925_p12 = scmp.lt.s32.totalorder %s56_s16, %s56_s16 }
  0x1c   :  { %p2921_p11 = scmp.ne.s32.totalorder %s56_s16, %s2920_s24  ;;  %p2926_p13 = scmp.lt.s32.totalorder %s2920_s24, %s2920_s24 }
  0x1e   :  { %p2927_p0 = por %p2926_p13, %p2925_p12 }
  0x20   :  { %p2928_p1 = pnand %p2927_p0, %p2921_p11 }
  0x22   :  { %2931 = shalt.err (!%p2928_p1)
}
  0x23   :  { %s3058_s1 = smov 256   ;;  %s3059_s25 = smov 16  }
  0x24   :  { %61 = dma.hbm_to_vmem [thread:$0]  %s3501_s3, 8192, %s56_s16, [#allocation12], %s3058_s1, %s3058_s1, %s3059_s25  }
  0x25   :  { %s3060_s28 = smov [#allocation5]   ;;  %s3061_s30 = smov [#allocation10]  }
  0x26   :  { %s22_s29 = sshll.u32 %s3060_s28, 4  ;;  %s43_s8 = sshll.u32 %s3061_s30, 4  ;;  %s23_s29 = int_to_ptr.vmem [resolvable:$true] %s22_s29  ;;  %s3144_s8 = int_to_ptr.vmem [resolvable:$true] %s43_s8 }
  0x27   :  { %s2932_s13 = scalar_lea.hbm %s3498_s0, 64 }
  0x28   :  { %p2933_p2 = scmp.ne.s32.totalorder %s3498_s0, %s2932_s13  ;;  %p2936_p3 = scmp.lt.u32.totalorder %s2932_s13, %s3498_s0 }
  0x2a   :  { %p2938_p4 = pnand %p2936_p3, %p2933_p2 }
  0x2c   :  { %2941 = shalt.err (!%p2938_p4)
}
  0x2d   :  { %s2942_s3 = scalar_lea.vmem %s23_s29, 64  ;;  %p2947_p6 = scmp.lt.s32.totalorder %s23_s29, %s23_s29 }
  0x2e   :  { %p2943_p5 = scmp.ne.s32.totalorder %s23_s29, %s2942_s3  ;;  %p2948_p7 = scmp.lt.s32.totalorder %s2942_s3, %s2942_s3 }
  0x30   :  { %p2949_p8 = por %p2948_p7, %p2947_p6 }
  0x32   :  { %p2950_p9 = pnand %p2949_p8, %p2943_p5 }
  0x34   :  { %2953 = shalt.err (!%p2950_p9)
}
  0x35   :  { %25 = dma.hbm_to_vmem [thread:$0]  %s3498_s0, 64, %s23_s29, [#allocation6]  }
  0x36   :  { %s2954_s22 = scalar_lea.hbm %s3500_s2, 2048 }
  0x37   :  { %p2955_p10 = scmp.ne.s32.totalorder %s3500_s2, %s2954_s22  ;;  %p2958_p11 = scmp.lt.u32.totalorder %s2954_s22, %s3500_s2 }
  0x39   :  { %p2960_p12 = pnand %p2958_p11, %p2955_p10 }
  0x3b   :  { %2963 = shalt.err (!%p2960_p12)
}
  0x3c   :  { %s2964_s26 = scalar_lea.vmem %s3144_s8, 2048  ;;  %p2969_p0 = scmp.lt.s32.totalorder %s3144_s8, %s3144_s8 }
  0x3d   :  { %p2965_p13 = scmp.ne.s32.totalorder %s3144_s8, %s2964_s26  ;;  %p2970_p1 = scmp.lt.s32.totalorder %s2964_s26, %s2964_s26 }
  0x3f   :  { %p2971_p2 = por %p2970_p1, %p2969_p0 }
  0x41   :  { %p2972_p3 = pnand %p2971_p2, %p2965_p13 }
  0x43   :  { %2975 = shalt.err (!%p2972_p3)
}
  0x44   :  { %s3062_s0 = smov 128   ;;  %s3063_s27 = smov 8  }
  0x45   :  { %49 = dma.hbm_to_vmem [thread:$0]  %s3500_s2, 2048, %s3144_s8, [#allocation9], %s3062_s0, %s3062_s0, %s3063_s27  }
  0x46   :  { %s3064_s30 = smov [#allocation13]   ;;  %s2976_s14 = scalar_lea.hbm %s3504_s6, 704 }
  0x47   :  { %s68_s9 = sshll.u32 %s3064_s30, 4  ;;  %p2977_p4 = scmp.ne.s32.totalorder %s3504_s6, %s2976_s14  ;;  %s69_s9 = int_to_ptr.vmem [resolvable:$true] %s68_s9 }
  0x48   :  { %p2980_p5 = scmp.lt.u32.totalorder %s2976_s14, %s3504_s6 }
  0x4a   :  { %p2982_p6 = pnand %p2980_p5, %p2977_p4 }
  0x4c   :  { %2985 = shalt.err (!%p2982_p6)
}
  0x4d   :  { %s2986_s16 = scalar_lea.vmem %s69_s9, 704  ;;  %p2991_p8 = scmp.lt.s32.totalorder %s69_s9, %s69_s9 }
  0x4e   :  { %p2987_p7 = scmp.ne.s32.totalorder %s69_s9, %s2986_s16  ;;  %p2992_p9 = scmp.lt.s32.totalorder %s2986_s16, %s2986_s16 }
  0x50   :  { %p2993_p10 = por %p2992_p9, %p2991_p8 }
  0x52   :  { %p2994_p11 = pnand %p2993_p10, %p2987_p7 }
  0x54   :  { %2997 = shalt.err (!%p2994_p11)
}
  0x55   :  { %71 = dma.hbm_to_vmem [thread:$0]  %s3504_s6, 704, %s69_s9, [#allocation12]  }
  0x56   :  { %3042 = dma.done.wait [#allocation6], 64  }
  0x57   :  { %3043 = vsyncadd [#allocation6], 4294967232 }
  0x58   :  { %3044 = dma.done.wait [#allocation9], 2560  }
  0x59   :  { %3045 = vsyncadd [#allocation9], 4294964736 }
  0x5a   :  { %3046 = dma.done.wait [#allocation12], 8896  }
  0x5b   :  { %3047 = vsyncadd [#allocation12], 4294958400  ;;  %s92_s19 = sld [smem:[#allocation0]]   ;;  %s3065_s20 = smov 1024   ;;  %v3066_v0 = vmov 0.0   ;;  %vm3067_vm0 = vmmov 0  }
  0x5c   :  { %104 = sst [smem:[#allocation16]] %s3065_s20  ;;  %2675 = vmatprep.subr.bf16.mxu0 %v3066_v0  ;;  %2683 = vmatprep.mubr.msk.bf16.mxu0 %vm3067_vm0, %v3066_v0  ;;  %s3068_s21 = smov [#allocation2]   ;;  %vm175_vm1 = vcmask 523264   ;;  %v3073_v22 = vmov 0  }
  0x5d   :  { %106 = sst [smem:[#allocation16 + $0x1]] %s3065_s20  ;;  %s100_s6 = sshll.u32 %s3068_s21, 4  ;;  %362 = vmatprep.mubr.bf16.mxu1 %v3073_v22  ;;  %s101_s6 = int_to_ptr.vmem [resolvable:$true] %s100_s6 }
  0x5e   :  { %108 = sst [smem:[#allocation16 + $0x2]] %s3063_s27  ;;  %s3069_s22 = smov 2  }
  0x5f   :  { %110 = sst [smem:[#allocation16 + $0x3]] %s3055_s11  ;;  %s3070_s24 = smov 512  }
  0x60   :  { %112 = sst [smem:[#allocation16 + $0x4]] %s3062_s0  ;;  %s3071_s25 = smov [#allocation4]  }
  0x61   :  { %114 = sst [smem:[#allocation16 + $0x5]] %s3069_s22  ;;  %s2491_s23 = sshll.u32 %s92_s19, 26 }
  0x62   :  { %116 = sst [smem:[#allocation16 + $0x6]] %s3070_s24  ;;  %s2492_s1 = sadd.s32 134217728, %s2491_s23 }
  0x63   :  { %118 = sst [smem:[#allocation16 + $0x7]] %s3055_s11  ;;  %s3072_s26 = smov [#allocation15]  }
  0x64   :  { %120 = sst [smem:[#allocation16 + $0x8]] %s3056_s12  ;;  %s2998_s29 = scalar_lea.hbm %s3503_s5, 8192 }
  0x65   :  { %122 = dma.general %s3502_s4, 32768, %s101_s6, %s3071_s25, %s3072_s26, [#allocation16], %s2492_s1, 0  }
  0x66   :  { %v2734_v1 = vld [vmem:[#allocation8] sm:$0xff]   ;;  %v2735_v2 = vld [vmem:[#allocation8 + $0x8] sm:$0xff]   ;;  %v2736_v5 = vld [vmem:[#allocation8 + $0x10] sm:$0xff]   ;;  %s3075_s4 = smov [#allocation3]   ;;  %p2999_p12 = scmp.ne.s32.totalorder %s3503_s5, %s2998_s29 }
  0x67   :  { %2676 = vmatpush3.bf16.msra.mxu0 %v2734_v1  ;;  %v2738_v3 = vld [vmem:[#allocation10 + $0x4] ss:$8 sps:$4 sm:$0xff]   ;;  %v2740_v4 = vld [vmem:[#allocation10] ss:$8 sps:$4 sm:$0xff]   ;;  %v2741_v6 = vld [vmem:[#allocation10 + $0x14] ss:$8 sps:$4 sm:$0xff]   ;;  %p3002_p13 = scmp.lt.u32.totalorder %s2998_s29, %s3503_s5 }
  0x68   :  { %2677 = vmatprep.subr.bf16.mxu0 %v3066_v0  ;;  %330 = vmatprep.subr.bf16.mxu1 %v2738_v3  ;;  %v2743_v7 = vld [vmem:[#allocation10 + $0x10] ss:$8 sps:$4 sm:$0xff]   ;;  %v2744_v8 = vld [vmem:[#allocation10 + $0x24] ss:$8 sps:$4 sm:$0xff]   ;;  %v135_v10 = vld [vmem:[#allocation5] sm:$0xf] }
  0x69   :  { %331 = vmatpush1.bf16.msra.mxu1 %v2740_v4  ;;  %v2737_v9 = vld [vmem:[#allocation8 + $0x18] sm:$0xff]   ;;  %v2746_v11 = vld [vmem:[#allocation10 + $0x20] ss:$8 sps:$4 sm:$0xff]   ;;  %v2750_v14 = vld [vmem:[#allocation10 + $0x44] ss:$8 sps:$4 sm:$0xff]   ;;  %s131_s11 = sshll.u32 %s3075_s4, 4  ;;  %p3004_p0 = pnand %p3002_p13, %p2999_p12  ;;  %s132_s11 = int_to_ptr.vmem [resolvable:$true] %s131_s11 }
  0x6a   :  { %332 = vmatprep.subr.bf16.mxu1 %v2741_v6  ;;  %v2747_v12 = vld [vmem:[#allocation10 + $0x34] ss:$8 sps:$4 sm:$0xff]   ;;  %v2749_v13 = vld [vmem:[#allocation10 + $0x30] ss:$8 sps:$4 sm:$0xff]   ;;  %v2752_v15 = vld [vmem:[#allocation10 + $0x40] ss:$8 sps:$4 sm:$0xff]  }
  0x6b   :  { %2678 = vmatpush3.bf16.msra.mxu0 %v2735_v2  ;;  %v2753_v16 = vld [vmem:[#allocation10 + $0x54] ss:$8 sps:$4 sm:$0xff]   ;;  %v2755_v17 = vld [vmem:[#allocation10 + $0x50] ss:$8 sps:$4 sm:$0xff]   ;;  %v2756_v18 = vld [vmem:[#allocation10 + $0x64] ss:$8 sps:$4 sm:$0xff]  }
  0x6c   :  { %2679 = vmatprep.subr.bf16.mxu0 %v3066_v0  ;;  %v2758_v19 = vld [vmem:[#allocation10 + $0x60] ss:$8 sps:$4 sm:$0xff]   ;;  %v2759_v20 = vld [vmem:[#allocation10 + $0x74] ss:$8 sps:$4 sm:$0xff]   ;;  %v2761_v21 = vld [vmem:[#allocation10 + $0x70] ss:$8 sps:$4 sm:$0xff]  }
  0x6d   :  { %333 = vmatpush1.bf16.msra.mxu1 %v2743_v7  ;;  %v2493_v23 = vld [vmem:[#allocation13] ss:$0 sm:$0xff]  ;;  %v2764_v32 = vld [vmem:[#allocation11 + $0x4] ss:$16 sps:$4 sm:$0xff]   ;;  %v2767_v33 = vld [vmem:[#allocation11 + $0xc] ss:$16 sps:$4 sm:$0xff]  }
  0x6e   :  { %334 = vmatprep.subr.bf16.mxu1 %v2744_v8  ;;  %v2762_v34 = vld [vmem:[#allocation11] ss:$16 sps:$4 sm:$0xff]   ;;  %v2765_v35 = vld [vmem:[#allocation11 + $0x8] ss:$16 sps:$4 sm:$0xff]   ;;  %v2770_v36 = vld [vmem:[#allocation11 + $0x24] ss:$16 sps:$4 sm:$0xff]  }
  0x6f   :  { %2680 = vmatpush3.bf16.msra.mxu0 %v2736_v5  ;;  %v2773_v37 = vld [vmem:[#allocation11 + $0x2c] ss:$16 sps:$4 sm:$0xff]   ;;  %v2768_v38 = vld [vmem:[#allocation11 + $0x20] ss:$16 sps:$4 sm:$0xff]   ;;  %v2771_v39 = vld [vmem:[#allocation11 + $0x28] ss:$16 sps:$4 sm:$0xff]  }
  0x70   :  { %2681 = vmatprep.subr.bf16.mxu0 %v3066_v0  ;;  %v2776_v40 = vld [vmem:[#allocation11 + $0x44] ss:$16 sps:$4 sm:$0xff]   ;;  %v2779_v41 = vld [vmem:[#allocation11 + $0x4c] ss:$16 sps:$4 sm:$0xff]   ;;  %v2774_v42 = vld [vmem:[#allocation11 + $0x40] ss:$16 sps:$4 sm:$0xff]  }
  0x71   :  { %335 = vmatpush1.bf16.msra.mxu1 %v2746_v11  ;;  %v2777_v43 = vld [vmem:[#allocation11 + $0x48] ss:$16 sps:$4 sm:$0xff]   ;;  %v2782_v44 = vld [vmem:[#allocation11 + $0x64] ss:$16 sps:$4 sm:$0xff]   ;;  %v2785_v45 = vld [vmem:[#allocation11 + $0x6c] ss:$16 sps:$4 sm:$0xff]  }
  0x72   :  { %336 = vmatprep.subr.bf16.mxu1 %v2747_v12  ;;  %v2780_v46 = vld [vmem:[#allocation11 + $0x60] ss:$16 sps:$4 sm:$0xff]   ;;  %v2783_v47 = vld [vmem:[#allocation11 + $0x68] ss:$16 sps:$4 sm:$0xff]   ;;  %v2788_v48 = vld [vmem:[#allocation11 + $0x84] ss:$16 sps:$4 sm:$0xff]  }
  0x73   :  { %2682 = vmatpush3.bf16.msra.mxu0 %v2737_v9  ;;  %v2791_v49 = vld [vmem:[#allocation11 + $0x8c] ss:$16 sps:$4 sm:$0xff]   ;;  %v2786_v50 = vld [vmem:[#allocation11 + $0x80] ss:$16 sps:$4 sm:$0xff]   ;;  %v2789_v51 = vld [vmem:[#allocation11 + $0x88] ss:$16 sps:$4 sm:$0xff]  }
  0x74   :  { %891 = vmatprep.subr.bf16.mxu0 %v2764_v32  ;;  %v2794_v52 = vld [vmem:[#allocation11 + $0xa4] ss:$16 sps:$4 sm:$0xff]   ;;  %v2797_v53 = vld [vmem:[#allocation11 + $0xac] ss:$16 sps:$4 sm:$0xff]   ;;  %v2792_v54 = vld [vmem:[#allocation11 + $0xa0] ss:$16 sps:$4 sm:$0xff]   ;;  %v240_v32 = vlaneseq }
  0x75   :  { %337 = vmatpush1.bf16.msra.mxu1 %v2749_v13  ;;  %v2795_v55 = vld [vmem:[#allocation11 + $0xa8] ss:$16 sps:$4 sm:$0xff]   ;;  %v2798_v56 = vld [vmem:[#allocation11 + $0xc0] ss:$16 sps:$4 sm:$0xff]   ;;  %v2800_v57 = vld [vmem:[#allocation11 + $0xc4] ss:$16 sps:$4 sm:$0xff]  }
  0x76   :  { %2684 = vmatmul.mubr.msk.bf16.vlgmr.msra.gmra.mrb[0].mxu0 %vm175_vm1, %v135_v10  ;;  %338 = vmatprep.subr.bf16.mxu1 %v2750_v14  ;;  %v2801_v58 = vld [vmem:[#allocation11 + $0xc8] ss:$16 sps:$4 sm:$0xff]   ;;  %v2803_v59 = vld [vmem:[#allocation11 + $0xcc] ss:$16 sps:$4 sm:$0xff]   ;;  %v2806_v60 = vld [vmem:[#allocation11 + $0xe4] ss:$16 sps:$4 sm:$0xff]  }
  0x77   :  { %892 = vmatpush1.bf16.msra.mxu0 %v2762_v34  ;;  %v2809_v61 = vld [vmem:[#allocation11 + $0xec] ss:$16 sps:$4 sm:$0xff]   ;;  %v2804_v62 = vld [vmem:[#allocation11 + $0xe0] ss:$16 sps:$4 sm:$0xff]   ;;  %v2807_v63 = vld [vmem:[#allocation11 + $0xe8] ss:$16 sps:$4 sm:$0xff]  }
  0x78   :  { %893 = vmatprep.subr.bf16.mxu0 %v2770_v36  ;;  %v2812_v0 = vld [vmem:[#allocation11 + $0x104] ss:$16 sps:$4 sm:$0xff]   ;;  %v2815_v1 = vld [vmem:[#allocation11 + $0x10c] ss:$16 sps:$4 sm:$0xff]   ;;  %v2810_v2 = vld [vmem:[#allocation11 + $0x100] ss:$16 sps:$4 sm:$0xff]  }
  0x79   :  { %339 = vmatpush1.bf16.msra.mxu1 %v2752_v15  ;;  %v2813_v3 = vld [vmem:[#allocation11 + $0x108] ss:$16 sps:$4 sm:$0xff]   ;;  %v2818_v4 = vld [vmem:[#allocation11 + $0x124] ss:$16 sps:$4 sm:$0xff]   ;;  %v2821_v5 = vld [vmem:[#allocation11 + $0x12c] ss:$16 sps:$4 sm:$0xff]  }
  0x7a   :  { %340 = vmatprep.subr.bf16.mxu1 %v2753_v16  ;;  %v2816_v6 = vld [vmem:[#allocation11 + $0x120] ss:$16 sps:$4 sm:$0xff]   ;;  %v2819_v7 = vld [vmem:[#allocation11 + $0x128] ss:$16 sps:$4 sm:$0xff]   ;;  %v2824_v8 = vld [vmem:[#allocation11 + $0x144] ss:$16 sps:$4 sm:$0xff]  }
  0x7b   :  { %894 = vmatpush1.bf16.msra.mxu0 %v2768_v38  ;;  %v2827_v9 = vld [vmem:[#allocation11 + $0x14c] ss:$16 sps:$4 sm:$0xff]   ;;  %v2822_v10 = vld [vmem:[#allocation11 + $0x140] ss:$16 sps:$4 sm:$0xff]   ;;  %v2825_v11 = vld [vmem:[#allocation11 + $0x148] ss:$16 sps:$4 sm:$0xff]  }
  0x7c   :  { %895 = vmatprep.subr.bf16.mxu0 %v2776_v40  ;;  %v2830_v12 = vld [vmem:[#allocation11 + $0x164] ss:$16 sps:$4 sm:$0xff]   ;;  %v2833_v13 = vld [vmem:[#allocation11 + $0x16c] ss:$16 sps:$4 sm:$0xff]   ;;  %v2828_v14 = vld [vmem:[#allocation11 + $0x160] ss:$16 sps:$4 sm:$0xff]  }
  0x7d   :  { %341 = vmatpush1.bf16.msra.mxu1 %v2755_v17  ;;  %v2831_v15 = vld [vmem:[#allocation11 + $0x168] ss:$16 sps:$4 sm:$0xff]   ;;  %v2836_v16 = vld [vmem:[#allocation11 + $0x184] ss:$16 sps:$4 sm:$0xff]   ;;  %v2839_v17 = vld [vmem:[#allocation11 + $0x18c] ss:$16 sps:$4 sm:$0xff]  }
  0x7e   :  { %342 = vmatprep.subr.bf16.mxu1 %v2756_v18  ;;  %v2834_v18 = vld [vmem:[#allocation11 + $0x180] ss:$16 sps:$4 sm:$0xff]  }
  0x7f   :  { %896 = vmatpush1.bf16.msra.mxu0 %v2774_v42  ;;  %v2840_v22 = vld [vmem:[#allocation11 + $0x1a0] ss:$16 sps:$4 sm:$0xff]  }
  0x80   :  { %897 = vmatprep.subr.bf16.mxu0 %v2782_v44 }
  0x81   :  { %343 = vmatpush1.bf16.msra.mxu1 %v2758_v19  ;;  %v2837_v19 = vld [vmem:[#allocation11 + $0x188] ss:$16 sps:$4 sm:$0xff]  }
  0x82   :  { %344 = vmatprep.subr.bf16.mxu1 %v2759_v20  ;;  %v2842_v20 = vld [vmem:[#allocation11 + $0x1a4] ss:$16 sps:$4 sm:$0xff]  }
  0x83   :  { %898 = vmatpush1.bf16.msra.mxu0 %v2780_v46 }
  0x84   :  { %899 = vmatprep.subr.bf16.mxu0 %v2788_v48 }
  0x85   :  { %345 = vmatpush1.bf16.msra.mxu1 %v2761_v21  ;;  %v2845_v21 = vld [vmem:[#allocation11 + $0x1ac] ss:$16 sps:$4 sm:$0xff]  }
  0x86   :  { %932 = vmatprep.subr.bf16.mxu1 %v2767_v33  ;;  %v3198_v33 = vshrl.u32 %v240_v32, 7 }
  0x87   :  { %900 = vmatpush1.bf16.msra.mxu0 %v2786_v50 }
  0x88   :  { %901 = vmatprep.subr.bf16.mxu0 %v2794_v52  ;;  %v3201_v34 = vsub.s32 0, %v3198_v33  ;;  %v3204_v36 = vsub.s32 1, %v3198_v33 }
  0x8b   :  { %902 = vmatpush1.bf16.msra.mxu0 %v2792_v54 }
  0x8c   :  { %903 = vmatprep.subr.bf16.mxu0 %v2800_v57 }
  0x8f   :  { %904 = vmatpush1.bf16.msra.mxu0 %v2798_v56 }
  0x90   :  { %905 = vmatprep.subr.bf16.mxu0 %v2806_v60 }
  0x93   :  { %906 = vmatpush1.bf16.msra.mxu0 %v2804_v62 }
  0x94   :  { %907 = vmatprep.subr.bf16.mxu0 %v2812_v0 }
  0x97   :  { %908 = vmatpush1.bf16.msra.mxu0 %v2810_v2 }
  0x98   :  { %909 = vmatprep.subr.bf16.mxu0 %v2818_v4 }
  0x9b   :  { %910 = vmatpush1.bf16.msra.mxu0 %v2816_v6 }
  0x9c   :  { %911 = vmatprep.subr.bf16.mxu0 %v2824_v8 }
  0x9f   :  { %912 = vmatpush1.bf16.msra.mxu0 %v2822_v10 }
  0xa0   :  { %913 = vmatprep.subr.bf16.mxu0 %v2830_v12 }
  0xa3   :  { %914 = vmatpush1.bf16.msra.mxu0 %v2828_v14 }
  0xa4   :  { %915 = vmatprep.subr.bf16.mxu0 %v2836_v16 }
  0xa7   :  { %916 = vmatpush1.bf16.msra.mxu0 %v2834_v18 }
  0xa8   :  { %917 = vmatprep.subr.bf16.mxu0 %v2842_v20 }
  0xab   :  { %918 = vmatpush1.bf16.msra.mxu0 %v2840_v22 }
 0x149   :  { %v213_v24 = vpop.f32.mrb[0].mxu0 }
 0x14a   :  { %v214_v25 = vadd.f32 %v2493_v23, %v213_v24  ;;  %v2685_v26 = vpop.f32.mrb[1].mxu0  ;;  %v2843_v23 = vld [vmem:[#allocation11 + $0x1a8] ss:$16 sps:$4 sm:$0xff]   ;;  %v2848_v24 = vld [vmem:[#allocation11 + $0x1c4] ss:$16 sps:$4 sm:$0xff]  }
 0x14b   :  { %v216_v27 = vpop.f32.mrb[2].mxu0  ;;  %v2846_v26 = vld [vmem:[#allocation11 + $0x1c0] ss:$16 sps:$4 sm:$0xff]   ;;  %919 = vmatprep.subr.bf16.mxu0 %v2848_v24 }
 0x14c   :  { %v219_v28 = vmul.f32 0.2, %v214_v25  ;;  %v2686_v29 = vpop.f32.mrb[3].mxu0  ;;  %v2849_v27 = vld [vmem:[#allocation11 + $0x1c8] ss:$16 sps:$4 sm:$0xff]   ;;  %920 = vmatpush1.bf16.msra.mxu0 %v2846_v26 }
 0x14d   :  { %v2857_v29 = vld [vmem:[#allocation11 + $0x1ec] ss:$16 sps:$4 sm:$0xff]  }
 0x14e   :  { %v220_v30 = vmax.f32 %v214_v25, %v219_v28  ;;  %v2851_v25 = vld [vmem:[#allocation11 + $0x1cc] ss:$16 sps:$4 sm:$0xff]   ;;  %v2854_v28 = vld [vmem:[#allocation11 + $0x1e4] ss:$16 sps:$4 sm:$0xff]  }
 0x14f   :  { %921 = vmatprep.subr.bf16.mxu0 %v2854_v28 }
 0x150   :  { %v237_v31 = vpack.c.bf16 %v220_v30, %v220_v30  ;;  %v2852_v30 = vld [vmem:[#allocation11 + $0x1e0] ss:$16 sps:$4 sm:$0xff]  }
 0x151   :  { %922 = vmatpush1.bf16.msra.mxu0 %v2852_v30 }
 0x152   :  { %363 = vmatmul.mubr.bf16.vlgmr.msra.gmra.mrb[0].mxu1 %v237_v31  ;;  %v2855_v31 = vld [vmem:[#allocation11 + $0x1e8] ss:$16 sps:$4 sm:$0xff]  }
 0x153   :  { %933 = vmatpush1.bf16.msra.mxu1 %v2765_v35  ;;  %v238_v35 = vld [vmem:[#allocation13 + $0x1] sm:$0x3] }
 0x154   :  { %934 = vmatprep.subr.bf16.mxu1 %v2773_v37  ;;  %v243_v37 = vrot.slane %v238_v35, %v3201_v34  ;;  %v247_v38 = vrot.slane %v238_v35, %v3204_v36 }
 0x157   :  { %935 = vmatpush1.bf16.msra.mxu1 %v2771_v39 }
 0x158   :  { %936 = vmatprep.subr.bf16.mxu1 %v2779_v41 }
 0x15b   :  { %937 = vmatpush1.bf16.msra.mxu1 %v2777_v43 }
 0x15c   :  { %938 = vmatprep.subr.bf16.mxu1 %v2785_v45 }
 0x15f   :  { %939 = vmatpush1.bf16.msra.mxu1 %v2783_v47 }
 0x160   :  { %940 = vmatprep.subr.bf16.mxu1 %v2791_v49 }
 0x163   :  { %941 = vmatpush1.bf16.msra.mxu1 %v2789_v51 }
 0x164   :  { %942 = vmatprep.subr.bf16.mxu1 %v2797_v53 }
 0x167   :  { %943 = vmatpush1.bf16.msra.mxu1 %v2795_v55 }
 0x168   :  { %944 = vmatprep.subr.bf16.mxu1 %v2803_v59 }
 0x16b   :  { %945 = vmatpush1.bf16.msra.mxu1 %v2801_v58 }
 0x16c   :  { %946 = vmatprep.subr.bf16.mxu1 %v2809_v61 }
 0x16f   :  { %947 = vmatpush1.bf16.msra.mxu1 %v2807_v63 }
 0x170   :  { %948 = vmatprep.subr.bf16.mxu1 %v2815_v1 }
 0x173   :  { %949 = vmatpush1.bf16.msra.mxu1 %v2813_v3 }
 0x174   :  { %950 = vmatprep.subr.bf16.mxu1 %v2821_v5 }
 0x177   :  { %951 = vmatpush1.bf16.msra.mxu1 %v2819_v7 }
 0x178   :  { %952 = vmatprep.subr.bf16.mxu1 %v2827_v9 }
 0x17b   :  { %953 = vmatpush1.bf16.msra.mxu1 %v2825_v11 }
 0x17c   :  { %954 = vmatprep.subr.bf16.mxu1 %v2833_v13 }
 0x17f   :  { %955 = vmatpush1.bf16.msra.mxu1 %v2831_v15 }
 0x180   :  { %956 = vmatprep.subr.bf16.mxu1 %v2839_v17 }
 0x183   :  { %957 = vmatpush1.bf16.msra.mxu1 %v2837_v19  ;;  %v3074_v19 = vmov 1966171168  }
 0x184   :  { %958 = vmatprep.subr.bf16.mxu1 %v2845_v21  ;;  %v417_v20 = vunpack.c.l.s4 %v3074_v19 }
 0x186   :  { %v418_v21 = vunpack.c.0.s8 %v417_v20 }
 0x187   :  { %959 = vmatpush1.bf16.msra.mxu1 %v2843_v23 }
 0x188   :  { %960 = vmatprep.subr.bf16.mxu1 %v2851_v25  ;;  %v3209_v23 = vsub.s32 %v418_v21, %v3198_v33 }
 0x18b   :  { %961 = vmatpush1.bf16.msra.mxu1 %v2849_v27  ;;  %v371_v27 = vld [vmem:[#allocation13 + $0x3] sm:$0x3] }
 0x18c   :  { %962 = vmatprep.subr.bf16.mxu1 %v2857_v29 }
 0x18f   :  { %963 = vmatpush1.bf16.msra.mxu1 %v2855_v31 }
 0x225   :  { %v364_v39 = vpop.f32.mrb[0].mxu1 }
 0x226   :  { %v365_v40 = vadd.f32 %v364_v39, %v243_v37  ;;  %v366_v41 = vpop.f32.mrb[1].mxu1 }
 0x227   :  { %v367_v42 = vadd.f32 %v366_v41, %v247_v38  ;;  %v368_v43 = vpop.f32.mrb[2].mxu1 }
 0x228   :  { %v373_v44 = vrot.slane %v365_v40, 4  ;;  %v385_v45 = vmul.f32 %v365_v40, %v365_v40  ;;  %v369_v46 = vpop.f32.mrb[3].mxu1  ;;  %v372_v43 = vld [vmem:[#allocation13 + $0x5] sm:$0x3] }
 0x229   :  { %v379_v47 = vrot.slane %v367_v42, 4  ;;  %v386_v48 = vmul.f32 %v367_v42, %v367_v42 }
 0x22a   :  { %v374_v49 = vadd.f32 %v373_v44, %v365_v40  ;;  %v387_v50 = vrot.slane %v385_v45, 4 }
 0x22b   :  { %v380_v51 = vadd.f32 %v379_v47, %v367_v42  ;;  %v393_v52 = vrot.slane %v386_v48, 4 }
 0x22c   :  { %v375_v53 = vrot.slane %v374_v49, 2  ;;  %v388_v54 = vadd.f32 %v387_v50, %v385_v45 }
 0x22d   :  { %v381_v55 = vrot.slane %v380_v51, 2  ;;  %v394_v56 = vadd.f32 %v393_v52, %v386_v48 }
 0x22e   :  { %v376_v57 = vadd.f32 %v375_v53, %v374_v49  ;;  %v389_v58 = vrot.slane %v388_v54, 2 }
 0x22f   :  { %v382_v59 = vadd.f32 %v381_v55, %v380_v51  ;;  %v395_v60 = vrot.slane %v394_v56, 2 }
 0x230   :  { %v377_v61 = vrot.slane %v376_v57, 1  ;;  %v390_v62 = vadd.f32 %v389_v58, %v388_v54 }
 0x231   :  { %v383_v63 = vrot.slane %v382_v59, 1  ;;  %v396_v0 = vadd.f32 %v395_v60, %v394_v56 }
 0x232   :  { %v378_v1 = vadd.f32 %v377_v61, %v376_v57  ;;  %v391_v2 = vrot.slane %v390_v62, 1 }
 0x233   :  { %v384_v3 = vadd.f32 %v383_v63, %v382_v59  ;;  %v397_v4 = vrot.slane %v396_v0, 1 }
 0x234   :  { %v392_v5 = vadd.f32 %v391_v2, %v390_v62  ;;  %v399_v6 = vmul.f32 0.125, %v378_v1 }
 0x235   :  { %v398_v7 = vadd.f32 %v397_v4, %v396_v0  ;;  %v400_v8 = vmul.f32 0.125, %v384_v3 }
 0x236   :  { %v401_v9 = vmul.f32 0.125, %v392_v5  ;;  %v403_v10 = vmul.f32 %v399_v6, %v399_v6 }
 0x237   :  { %v402_v11 = vmul.f32 0.125, %v398_v7  ;;  %v404_v12 = vmul.f32 %v400_v8, %v400_v8 }
 0x238   :  { %v405_v13 = vsub.f32 %v401_v9, %v403_v10 }
 0x239   :  { %v406_v14 = vsub.f32 %v402_v11, %v404_v12 }
 0x23a   :  { %v407_v15 = vmax.f32 %v405_v13, 0.0 }
 0x23b   :  { %v408_v16 = vmax.f32 %v406_v14, 0.0 }
 0x23c   :  { %v409_v17 = vadd.f32 0.8, %v407_v15 }
 0x23d   :  { %v410_v18 = vadd.f32 0.8, %v408_v16 }
 0x23e   :  { %2858 = vrsqrt.f32 %v409_v17 }
 0x23f   :  { %2860 = vrsqrt.f32 %v410_v18 }
 0x248   :  { %v2859_v22 = vpop.eup %2858 }
 0x249   :  { %v2861_v24 = vpop.eup %2860 }
 0x24a   :  { %v415_v25 = vcombine.low %v2859_v22, %v2861_v24 }
 0x24c   :  { %v422_v26 = vrot.slane %v415_v25, %v3209_v23 }
 0x24e   :  { %v429_v28 = vrot.slane %v422_v26, %v3209_v23 }
 0x250   :  { %v431_v29 = vmul.f32 %v429_v28, %v371_v27 }
 0x252   :  { %v436_v30 = vrot.slane %v431_v29, %v3201_v34  ;;  %v440_v31 = vrot.slane %v431_v29, %v3204_v36 }
 0x254   :  { %v443_v32 = vmul.f32 %v436_v30, %v399_v6  ;;  %v444_v35 = vmul.f32 %v440_v31, %v400_v8  ;;  %v465_v37 = vmul.f32 %v440_v31, %v367_v42  ;;  %v464_v38 = vmul.f32 %v436_v30, %v365_v40 }
 0x256   :  { %v447_v39 = vcombine.low %v443_v32, %v444_v35 }
 0x258   :  { %v454_v41 = vrot.slane %v447_v39, %v3209_v23 }
 0x25a   :  { %v461_v44 = vrot.slane %v454_v41, %v3209_v23 }
 0x25c   :  { %v463_v45 = vsub.f32 %v372_v43, %v461_v44 }
 0x25e   :  { %v474_v46 = vrot.slane %v463_v45, %v3204_v36  ;;  %v470_v47 = vrot.slane %v463_v45, %v3201_v34 }
 0x260   :  { %v478_v48 = vadd.f32 %v474_v46, %v465_v37  ;;  %v477_v49 = vadd.f32 %v470_v47, %v464_v38 }
 0x262   :  { %v480_v50 = vmul.f32 0.2, %v478_v48  ;;  %v479_v51 = vmul.f32 0.2, %v477_v49 }
 0x264   :  { %v482_v52 = vmax.f32 %v478_v48, %v480_v50  ;;  %v481_v53 = vmax.f32 %v477_v49, %v479_v51 }
 0x266   :  { %v548_v54 = vpack.c.bf16 %v482_v52, %v482_v52  ;;  %v547_v42 = vpack.c.bf16 %v481_v53, %v481_v53 }
 0x268   :  { %923 = vmatprep.mubr.bf16.mxu0 %v548_v54  ;;  %964 = vmatprep.mubr.bf16.mxu1 %v548_v54 }
 0x269   :  { %924 = vmatmul.mubr.bf16.vlgmr.msra.gmra.mrb[4].mxu0 %v547_v42  ;;  %965 = vmatmul.mubr.bf16.vlgmr.msra.gmra.mrb[4].mxu1 %v547_v42 }
 0x26a   :  { %3007 = shalt.err (!%p3004_p0)  }
 0x26b   :  { %s3008_s14 = scalar_lea.vmem %s132_s11, 8192  ;;  %p3013_p2 = scmp.lt.s32.totalorder %s132_s11, %s132_s11 }
 0x26c   :  { %p3009_p1 = scmp.ne.s32.totalorder %s132_s11, %s3008_s14  ;;  %p3014_p3 = scmp.lt.s32.totalorder %s3008_s14, %s3008_s14 }
 0x26e   :  { %p3015_p4 = por %p3014_p3, %p3013_p2 }
 0x270   :  { %p3016_p5 = pnand %p3015_p4, %p3009_p1 }
 0x272   :  { %3019 = shalt.err (!%p3016_p5)  }
 0x273   :  { %134 = dma.hbm_to_vmem [thread:$0]  %s3503_s5, 8192, %s132_s11, [#allocation4 + $0x1]  ;;  %v3232_v40 = vsub.s32 2, %v3198_v33  ;;  %v549_v55 = vld [vmem:[#allocation13 + $0x7] sm:$0xf]  ;;  %v3235_v56 = vsub.s32 3, %v3198_v33 }
 0x274   :  { %v554_v57 = vrot.slane %v549_v55, %v3201_v34  ;;  %v558_v59 = vrot.slane %v549_v55, %v3204_v36 }
 0x275   :  { %v562_v58 = vrot.slane %v549_v55, %v3232_v40  ;;  %v566_v60 = vrot.slane %v549_v55, %v3235_v56 }
 0x33c   :  { %v925_v61 = vpop.f32.mrb[4].mxu0  ;;  %v966_v62 = vpop.f32.mrb[4].mxu1 }
 0x33d   :  { %v3241_v63 = vadd.f32 %v925_v61, %v554_v57  ;;  %v3243_v0 = vadd.f32 %v966_v62, %v562_v58  ;;  %v927_v1 = vpop.f32.mrb[5].mxu0  ;;  %v968_v2 = vpop.f32.mrb[5].mxu1 }
 0x33e   :  { %v3245_v3 = vadd.f32 %v927_v1, %v558_v59  ;;  %v3247_v4 = vadd.f32 %v968_v2, %v566_v60  ;;  %v929_v5 = vpop.f32.mrb[6].mxu0  ;;  %v970_v6 = vpop.f32.mrb[6].mxu1 }
 0x33f   :  { %v975_v7 = vrot.slane %v3241_v63, 4  ;;  %v999_v8 = vmul.f32 %v3241_v63, %v3241_v63  ;;  %v987_v9 = vrot.slane %v3243_v0, 4  ;;  %v1001_v10 = vmul.f32 %v3243_v0, %v3243_v0  ;;  %v930_v11 = vpop.f32.mrb[7].mxu0  ;;  %v971_v12 = vpop.f32.mrb[7].mxu1 }
 0x340   :  { %v981_v13 = vrot.slane %v3245_v3, 4  ;;  %v1000_v14 = vmul.f32 %v3245_v3, %v3245_v3  ;;  %v993_v15 = vrot.slane %v3247_v4, 4  ;;  %v1002_v16 = vmul.f32 %v3247_v4, %v3247_v4 }
 0x341   :  { %v976_v17 = vadd.f32 %v975_v7, %v3241_v63  ;;  %v1003_v18 = vrot.slane %v999_v8, 4  ;;  %v988_v19 = vadd.f32 %v987_v9, %v3243_v0  ;;  %v1015_v20 = vrot.slane %v1001_v10, 4 }
 0x342   :  { %v982_v21 = vadd.f32 %v981_v13, %v3245_v3  ;;  %v1009_v22 = vrot.slane %v1000_v14, 4  ;;  %v994_v24 = vadd.f32 %v993_v15, %v3247_v4  ;;  %v1021_v25 = vrot.slane %v1002_v16, 4 }
 0x343   :  { %v977_v26 = vrot.slane %v976_v17, 2  ;;  %v1004_v27 = vadd.f32 %v1003_v18, %v999_v8  ;;  %v989_v28 = vrot.slane %v988_v19, 2  ;;  %v1016_v29 = vadd.f32 %v1015_v20, %v1001_v10 }
 0x344   :  { %v983_v30 = vrot.slane %v982_v21, 2  ;;  %v1010_v31 = vadd.f32 %v1009_v22, %v1000_v14  ;;  %v995_v32 = vrot.slane %v994_v24, 2  ;;  %v1022_v35 = vadd.f32 %v1021_v25, %v1002_v16 }
 0x345   :  { %v978_v37 = vadd.f32 %v977_v26, %v976_v17  ;;  %v1005_v38 = vrot.slane %v1004_v27, 2  ;;  %v990_v39 = vadd.f32 %v989_v28, %v988_v19  ;;  %v1017_v41 = vrot.slane %v1016_v29, 2 }
 0x346   :  { %v984_v43 = vadd.f32 %v983_v30, %v982_v21  ;;  %v1011_v44 = vrot.slane %v1010_v31, 2  ;;  %v996_v45 = vadd.f32 %v995_v32, %v994_v24  ;;  %v1023_v46 = vrot.slane %v1022_v35, 2 }
 0x347   :  { %v979_v47 = vrot.slane %v978_v37, 1  ;;  %v1006_v48 = vadd.f32 %v1005_v38, %v1004_v27  ;;  %v991_v49 = vrot.slane %v990_v39, 1  ;;  %v1018_v50 = vadd.f32 %v1017_v41, %v1016_v29 }
 0x348   :  { %v985_v51 = vrot.slane %v984_v43, 1  ;;  %v1012_v52 = vadd.f32 %v1011_v44, %v1010_v31  ;;  %v997_v53 = vrot.slane %v996_v45, 1  ;;  %v1024_v54 = vadd.f32 %v1023_v46, %v1022_v35  ;;  %v973_v46 = vld [vmem:[#allocation13 + $0xb] sm:$0xf] }
 0x349   :  { %v980_v42 = vadd.f32 %v979_v47, %v978_v37  ;;  %v1007_v55 = vrot.slane %v1006_v48, 1  ;;  %v992_v57 = vadd.f32 %v991_v49, %v990_v39  ;;  %v1019_v58 = vrot.slane %v1018_v50, 1 }
 0x34a   :  { %v986_v59 = vadd.f32 %v985_v51, %v984_v43  ;;  %v1013_v60 = vrot.slane %v1012_v52, 1  ;;  %v998_v61 = vadd.f32 %v997_v53, %v996_v45  ;;  %v1025_v62 = vrot.slane %v1024_v54, 1 }
 0x34b   :  { %v1008_v1 = vadd.f32 %v1007_v55, %v1006_v48  ;;  %v1027_v2 = vmul.f32 0.125, %v980_v42  ;;  %v1020_v5 = vadd.f32 %v1019_v58, %v1018_v50  ;;  %v1029_v6 = vmul.f32 0.125, %v992_v57 }
 0x34c   :  { %v1014_v7 = vadd.f32 %v1013_v60, %v1012_v52  ;;  %v1028_v8 = vmul.f32 0.125, %v986_v59  ;;  %v1026_v9 = vadd.f32 %v1025_v62, %v1024_v54  ;;  %v1030_v10 = vmul.f32 0.125, %v998_v61 }
 0x34d   :  { %v1031_v11 = vmul.f32 0.125, %v1008_v1  ;;  %v1035_v12 = vmul.f32 %v1027_v2, %v1027_v2  ;;  %v1033_v13 = vmul.f32 0.125, %v1020_v5  ;;  %v1037_v14 = vmul.f32 %v1029_v6, %v1029_v6 }
 0x34e   :  { %v1032_v15 = vmul.f32 0.125, %v1014_v7  ;;  %v1036_v16 = vmul.f32 %v1028_v8, %v1028_v8  ;;  %v1034_v17 = vmul.f32 0.125, %v1026_v9  ;;  %v1038_v18 = vmul.f32 %v1030_v10, %v1030_v10  ;;  %v974_v9 = vld [vmem:[#allocation13 + $0xf] sm:$0xf] }
 0x34f   :  { %v1039_v19 = vsub.f32 %v1031_v11, %v1035_v12  ;;  %v1041_v20 = vsub.f32 %v1033_v13, %v1037_v14 }
 0x350   :  { %v1040_v21 = vsub.f32 %v1032_v15, %v1036_v16  ;;  %v1042_v22 = vsub.f32 %v1034_v17, %v1038_v18 }
 0x351   :  { %v1043_v24 = vmax.f32 %v1039_v19, 0.0  ;;  %v1045_v25 = vmax.f32 %v1041_v20, 0.0 }
 0x352   :  { %v1044_v26 = vmax.f32 %v1040_v21, 0.0  ;;  %v1046_v27 = vmax.f32 %v1042_v22, 0.0 }
 0x353   :  { %v1047_v28 = vadd.f32 0.8, %v1043_v24  ;;  %v1049_v29 = vadd.f32 0.8, %v1045_v25 }
 0x354   :  { %v1048_v30 = vadd.f32 0.8, %v1044_v26  ;;  %v1050_v31 = vadd.f32 0.8, %v1046_v27 }
 0x355   :  { %2862 = vrsqrt.f32 %v1047_v28 }
 0x356   :  { %2864 = vrsqrt.f32 %v1049_v29 }
 0x357   :  { %2866 = vrsqrt.f32 %v1048_v30 }
 0x358   :  { %2868 = vrsqrt.f32 %v1050_v31 }
 0x35f   :  { %v2863_v32 = vpop.eup %2862 }
 0x360   :  { %v2865_v35 = vpop.eup %2864 }
 0x361   :  { %v2867_v37 = vpop.eup %2866 }
 0x362   :  { %v2869_v38 = vpop.eup %2868  ;;  %v1059_v39 = vcombine.low %v2863_v32, %v2867_v37 }
 0x363   :  { %v1060_v41 = vcombine.low %v2865_v35, %v2869_v38 }
 0x364   :  { %v1067_v43 = vrot.slane %v1059_v39, %v3209_v23 }
 0x365   :  { %v1074_v44 = vrot.slane %v1060_v41, %v3209_v23 }
 0x367   :  { %v1075_v45 = vcombine.low %v1067_v43, %v1074_v44 }
 0x369   :  { %v1082_v47 = vrot.slane %v1075_v45, %v3209_v23 }
 0x36b   :  { %v1084_v48 = vmul.f32 %v1082_v47, %v973_v46 }
 0x36d   :  { %v1089_v49 = vrot.slane %v1084_v48, %v3201_v34  ;;  %v1093_v50 = vrot.slane %v1084_v48, %v3204_v36  ;;  %v1097_v51 = vrot.slane %v1084_v48, %v3232_v40  ;;  %v1101_v52 = vrot.slane %v1084_v48, %v3235_v56 }
 0x36f   :  { %v1106_v53 = vmul.f32 %v1089_v49, %v1027_v2  ;;  %v1107_v54 = vmul.f32 %v1093_v50, %v1028_v8  ;;  %v1108_v42 = vmul.f32 %v1097_v51, %v1029_v6  ;;  %v1109_v55 = vmul.f32 %v1101_v52, %v1030_v10 }
 0x370   :  { %v1140_v57 = vmul.f32 %v1089_v49, %v3241_v63  ;;  %v1141_v58 = vmul.f32 %v1093_v50, %v3245_v3  ;;  %v1142_v59 = vmul.f32 %v1097_v51, %v3243_v0  ;;  %v1143_v60 = vmul.f32 %v1101_v52, %v3247_v4 }
 0x371   :  { %v1114_v61 = vcombine.low %v1106_v53, %v1107_v54  ;;  %v1115_v62 = vcombine.low %v1108_v42, %v1109_v55 }
 0x373   :  { %v1122_v1 = vrot.slane %v1114_v61, %v3209_v23  ;;  %v1129_v5 = vrot.slane %v1115_v62, %v3209_v23 }
 0x375   :  { %v1130_v7 = vcombine.low %v1122_v1, %v1129_v5 }
 0x377   :  { %v1137_v2 = vrot.slane %v1130_v7, %v3209_v23 }
 0x379   :  { %v1139_v6 = vsub.f32 %v974_v9, %v1137_v2 }
 0x37b   :  { %v1148_v8 = vrot.slane %v1139_v6, %v3201_v34  ;;  %v1152_v63 = vrot.slane %v1139_v6, %v3204_v36  ;;  %v1156_v3 = vrot.slane %v1139_v6, %v3232_v40  ;;  %v1160_v0 = vrot.slane %v1139_v6, %v3235_v56 }
 0x37d   :  { %v1165_v4 = vadd.f32 %v1148_v8, %v1140_v57  ;;  %v1166_v10 = vadd.f32 %v1152_v63, %v1141_v58  ;;  %v1167_v11 = vadd.f32 %v1156_v3, %v1142_v59  ;;  %v1168_v12 = vadd.f32 %v1160_v0, %v1143_v60 }
 0x37f   :  { %v1169_v13 = vmul.f32 0.2, %v1165_v4  ;;  %v1170_v14 = vmul.f32 0.2, %v1166_v10  ;;  %v1171_v15 = vmul.f32 0.2, %v1167_v11 }
 0x380   :  { %v1172_v16 = vmul.f32 0.2, %v1168_v12 }
 0x381   :  { %v3283_v17 = vmax.f32 %v1165_v4, %v1169_v13  ;;  %v1174_v18 = vmax.f32 %v1166_v10, %v1170_v14  ;;  %v3285_v19 = vmax.f32 %v1167_v11, %v1171_v15 }
 0x382   :  { %v3287_v20 = vmax.f32 %v1168_v12, %v1172_v16 }
 0x383   :  { %3048 = dma.done.wait [#allocation4], 32768 }
 0x384   :  { %3049 = vsyncadd [#allocation4], 4294934528  ;;  %v3289_v21 = vpack.c.bf16 %v1174_v18, %v1174_v18  ;;  %v1182_v22 = vld [vmem:[#allocation2 + $0x8] sm:$0xff]  ;;  %v1184_v24 = vld [vmem:[#allocation2 + $0x18] sm:$0xff] }
 0x385   :  { %v1181_v25 = vld [vmem:[#allocation2] sm:$0xff]  ;;  %1483 = vmatprep.subr.bf16.mxu0 %v1182_v22  ;;  %1565 = vmatprep.subr.bf16.mxu1 %v1184_v24  ;;  %v1183_v26 = vld [vmem:[#allocation2 + $0x10] sm:$0xff]  ;;  %v1190_v27 = vld [vmem:[#allocation2 + $0x48] sm:$0xff] }
 0x386   :  { %1515 = vmatprep.mubr.bf16.mxu0 %v3289_v21  ;;  %1597 = vmatprep.mubr.bf16.mxu1 %v3289_v21  ;;  %v1192_v28 = vld [vmem:[#allocation2 + $0x58] sm:$0xff]  ;;  %v1189_v29 = vld [vmem:[#allocation2 + $0x40] sm:$0xff]  ;;  %v1191_v30 = vld [vmem:[#allocation2 + $0x50] sm:$0xff] }
 0x387   :  { %1484 = vmatpush1.bf16.msra.mxu0 %v1181_v25  ;;  %1566 = vmatpush1.bf16.msra.mxu1 %v1183_v26  ;;  %v1198_v31 = vld [vmem:[#allocation2 + $0x88] sm:$0xff]  ;;  %v1200_v32 = vld [vmem:[#allocation2 + $0x98] sm:$0xff]  ;;  %v1197_v35 = vld [vmem:[#allocation2 + $0x80] sm:$0xff] }
 0x388   :  { %1485 = vmatprep.subr.bf16.mxu0 %v1190_v27  ;;  %1567 = vmatprep.subr.bf16.mxu1 %v1192_v28  ;;  %v1199_v37 = vld [vmem:[#allocation2 + $0x90] sm:$0xff]  ;;  %v1206_v38 = vld [vmem:[#allocation2 + $0xc8] sm:$0xff]  ;;  %v1208_v39 = vld [vmem:[#allocation2 + $0xd8] sm:$0xff] }
 0x389   :  { %v1205_v41 = vld [vmem:[#allocation2 + $0xc0] sm:$0xff]  ;;  %v1207_v43 = vld [vmem:[#allocation2 + $0xd0] sm:$0xff]  ;;  %v1214_v44 = vld [vmem:[#allocation2 + $0x108] sm:$0xff] }
 0x38a   :  { %v1216_v45 = vld [vmem:[#allocation2 + $0x118] sm:$0xff]  ;;  %v1213_v46 = vld [vmem:[#allocation2 + $0x100] sm:$0xff]  ;;  %v1215_v47 = vld [vmem:[#allocation2 + $0x110] sm:$0xff] }
 0x38b   :  { %1486 = vmatpush1.bf16.msra.mxu0 %v1189_v29  ;;  %1568 = vmatpush1.bf16.msra.mxu1 %v1191_v30  ;;  %v1222_v48 = vld [vmem:[#allocation2 + $0x148] sm:$0xff]  ;;  %v1224_v49 = vld [vmem:[#allocation2 + $0x158] sm:$0xff]  ;;  %v1221_v50 = vld [vmem:[#allocation2 + $0x140] sm:$0xff] }
 0x38c   :  { %1487 = vmatprep.subr.bf16.mxu0 %v1198_v31  ;;  %1569 = vmatprep.subr.bf16.mxu1 %v1200_v32  ;;  %v1223_v51 = vld [vmem:[#allocation2 + $0x150] sm:$0xff]  ;;  %v1230_v52 = vld [vmem:[#allocation2 + $0x188] sm:$0xff]  ;;  %v1232_v53 = vld [vmem:[#allocation2 + $0x198] sm:$0xff] }
 0x38d   :  { %v1229_v54 = vld [vmem:[#allocation2 + $0x180] sm:$0xff]  ;;  %v1231_v42 = vld [vmem:[#allocation2 + $0x190] sm:$0xff]  ;;  %v1238_v55 = vld [vmem:[#allocation2 + $0x1c8] sm:$0xff] }
 0x38e   :  { %v1240_v57 = vld [vmem:[#allocation2 + $0x1d8] sm:$0xff]  ;;  %v1237_v58 = vld [vmem:[#allocation2 + $0x1c0] sm:$0xff]  ;;  %v1239_v59 = vld [vmem:[#allocation2 + $0x1d0] sm:$0xff] }
 0x38f   :  { %1488 = vmatpush1.bf16.msra.mxu0 %v1197_v35  ;;  %1570 = vmatpush1.bf16.msra.mxu1 %v1199_v37  ;;  %v1246_v60 = vld [vmem:[#allocation2 + $0x208] sm:$0xff]  ;;  %v1248_v61 = vld [vmem:[#allocation2 + $0x218] sm:$0xff]  ;;  %v1245_v62 = vld [vmem:[#allocation2 + $0x200] sm:$0xff] }
 0x390   :  { %1489 = vmatprep.subr.bf16.mxu0 %v1206_v38  ;;  %1571 = vmatprep.subr.bf16.mxu1 %v1208_v39  ;;  %v1247_v1 = vld [vmem:[#allocation2 + $0x210] sm:$0xff]  ;;  %v1254_v5 = vld [vmem:[#allocation2 + $0x248] sm:$0xff]  ;;  %v1256_v7 = vld [vmem:[#allocation2 + $0x258] sm:$0xff]  ;;  %v3295_v38 = vpack.c.bf16 %v3283_v17, %v3283_v17 }
 0x391   :  { %v1253_v9 = vld [vmem:[#allocation2 + $0x240] sm:$0xff]  ;;  %v1255_v2 = vld [vmem:[#allocation2 + $0x250] sm:$0xff]  ;;  %v1262_v6 = vld [vmem:[#allocation2 + $0x288] sm:$0xff] }
 0x392   :  { %v1264_v8 = vld [vmem:[#allocation2 + $0x298] sm:$0xff]  ;;  %v1261_v63 = vld [vmem:[#allocation2 + $0x280] sm:$0xff]  ;;  %v1263_v3 = vld [vmem:[#allocation2 + $0x290] sm:$0xff] }
 0x393   :  { %1490 = vmatpush1.bf16.msra.mxu0 %v1205_v41  ;;  %1572 = vmatpush1.bf16.msra.mxu1 %v1207_v43  ;;  %v1270_v0 = vld [vmem:[#allocation2 + $0x2c8] sm:$0xff]  ;;  %v1272_v4 = vld [vmem:[#allocation2 + $0x2d8] sm:$0xff]  ;;  %v1269_v10 = vld [vmem:[#allocation2 + $0x2c0] sm:$0xff] }
 0x394   :  { %1491 = vmatprep.subr.bf16.mxu0 %v1214_v44  ;;  %1573 = vmatprep.subr.bf16.mxu1 %v1216_v45  ;;  %v1271_v11 = vld [vmem:[#allocation2 + $0x2d0] sm:$0xff]  ;;  %v1278_v12 = vld [vmem:[#allocation2 + $0x308] sm:$0xff]  ;;  %v1280_v13 = vld [vmem:[#allocation2 + $0x318] sm:$0xff]  ;;  %v3299_v45 = vpack.c.bf16 %v3287_v20, %v3287_v20 }
 0x395   :  { %v1277_v14 = vld [vmem:[#allocation2 + $0x300] sm:$0xff]  ;;  %v1279_v15 = vld [vmem:[#allocation2 + $0x310] sm:$0xff]  ;;  %v1286_v16 = vld [vmem:[#allocation2 + $0x348] sm:$0xff] }
 0x396   :  { %v1288_v18 = vld [vmem:[#allocation2 + $0x358] sm:$0xff]  ;;  %v1285_v22 = vld [vmem:[#allocation2 + $0x340] sm:$0xff]  ;;  %v1287_v24 = vld [vmem:[#allocation2 + $0x350] sm:$0xff] }
 0x397   :  { %1492 = vmatpush1.bf16.msra.mxu0 %v1213_v46  ;;  %1574 = vmatpush1.bf16.msra.mxu1 %v1215_v47  ;;  %v1294_v25 = vld [vmem:[#allocation2 + $0x388] sm:$0xff]  ;;  %v1296_v26 = vld [vmem:[#allocation2 + $0x398] sm:$0xff]  ;;  %v1293_v27 = vld [vmem:[#allocation2 + $0x380] sm:$0xff] }
 0x398   :  { %1493 = vmatprep.subr.bf16.mxu0 %v1222_v48  ;;  %1575 = vmatprep.subr.bf16.mxu1 %v1224_v49  ;;  %v1295_v28 = vld [vmem:[#allocation2 + $0x390] sm:$0xff]  ;;  %v1302_v29 = vld [vmem:[#allocation2 + $0x3c8] sm:$0xff]  ;;  %v1304_v30 = vld [vmem:[#allocation2 + $0x3d8] sm:$0xff] }
 0x399   :  { %v1301_v31 = vld [vmem:[#allocation2 + $0x3c0] sm:$0xff]  ;;  %v1303_v32 = vld [vmem:[#allocation2 + $0x3d0] sm:$0xff]  ;;  %v1310_v35 = vld [vmem:[#allocation2 + $0x408] sm:$0xff] }
 0x39a   :  { %v1312_v37 = vld [vmem:[#allocation2 + $0x418] sm:$0xff]  ;;  %v1309_v39 = vld [vmem:[#allocation2 + $0x400] sm:$0xff]  ;;  %v1311_v41 = vld [vmem:[#allocation2 + $0x410] sm:$0xff] }
 0x39b   :  { %1494 = vmatpush1.bf16.msra.mxu0 %v1221_v50  ;;  %1576 = vmatpush1.bf16.msra.mxu1 %v1223_v51  ;;  %v1318_v43 = vld [vmem:[#allocation2 + $0x448] sm:$0xff]  ;;  %v1320_v44 = vld [vmem:[#allocation2 + $0x458] sm:$0xff]  ;;  %v1317_v17 = vld [vmem:[#allocation2 + $0x440] sm:$0xff] }
 0x39c   :  { %1495 = vmatprep.subr.bf16.mxu0 %v1230_v52  ;;  %1577 = vmatprep.subr.bf16.mxu1 %v1232_v53  ;;  %v1319_v46 = vld [vmem:[#allocation2 + $0x450] sm:$0xff]  ;;  %v1326_v47 = vld [vmem:[#allocation2 + $0x488] sm:$0xff]  ;;  %v1328_v48 = vld [vmem:[#allocation2 + $0x498] sm:$0xff] }
 0x39d   :  { %v1325_v20 = vld [vmem:[#allocation2 + $0x480] sm:$0xff]  ;;  %v1327_v49 = vld [vmem:[#allocation2 + $0x490] sm:$0xff]  ;;  %v1334_v50 = vld [vmem:[#allocation2 + $0x4c8] sm:$0xff] }
 0x39e   :  { %v1336_v51 = vld [vmem:[#allocation2 + $0x4d8] sm:$0xff]  ;;  %v1333_v52 = vld [vmem:[#allocation2 + $0x4c0] sm:$0xff]  ;;  %v1335_v53 = vld [vmem:[#allocation2 + $0x4d0] sm:$0xff] }
 0x39f   :  { %1496 = vmatpush1.bf16.msra.mxu0 %v1229_v54  ;;  %1578 = vmatpush1.bf16.msra.mxu1 %v1231_v42  ;;  %v1342_v54 = vld [vmem:[#allocation2 + $0x508] sm:$0xff]  ;;  %v1344_v42 = vld [vmem:[#allocation2 + $0x518] sm:$0xff] }
 0x3a0   :  { %1497 = vmatprep.subr.bf16.mxu0 %v1238_v55  ;;  %1579 = vmatprep.subr.bf16.mxu1 %v1240_v57  ;;  %v1341_v55 = vld [vmem:[#allocation2 + $0x500] sm:$0xff]  ;;  %v1343_v57 = vld [vmem:[#allocation2 + $0x510] sm:$0xff] }
 0x3a3   :  { %1498 = vmatpush1.bf16.msra.mxu0 %v1237_v58  ;;  %1580 = vmatpush1.bf16.msra.mxu1 %v1239_v59  ;;  %v1350_v58 = vld [vmem:[#allocation2 + $0x548] sm:$0xff]  ;;  %v1352_v59 = vld [vmem:[#allocation2 + $0x558] sm:$0xff] }
 0x3a4   :  { %1499 = vmatprep.subr.bf16.mxu0 %v1246_v60  ;;  %1581 = vmatprep.subr.bf16.mxu1 %v1248_v61  ;;  %v1349_v60 = vld [vmem:[#allocation2 + $0x540] sm:$0xff]  ;;  %v1351_v61 = vld [vmem:[#allocation2 + $0x550] sm:$0xff] }
 0x3a7   :  { %1500 = vmatpush1.bf16.msra.mxu0 %v1245_v62  ;;  %1582 = vmatpush1.bf16.msra.mxu1 %v1247_v1  ;;  %v1358_v62 = vld [vmem:[#allocation2 + $0x588] sm:$0xff]  ;;  %v1360_v1 = vld [vmem:[#allocation2 + $0x598] sm:$0xff] }
 0x3a8   :  { %1501 = vmatprep.subr.bf16.mxu0 %v1254_v5  ;;  %1583 = vmatprep.subr.bf16.mxu1 %v1256_v7  ;;  %v1357_v5 = vld [vmem:[#allocation2 + $0x580] sm:$0xff]  ;;  %v1359_v7 = vld [vmem:[#allocation2 + $0x590] sm:$0xff] }
 0x3ab   :  { %1502 = vmatpush1.bf16.msra.mxu0 %v1253_v9  ;;  %1584 = vmatpush1.bf16.msra.mxu1 %v1255_v2  ;;  %v1366_v9 = vld [vmem:[#allocation2 + $0x5c8] sm:$0xff]  ;;  %v1368_v2 = vld [vmem:[#allocation2 + $0x5d8] sm:$0xff] }
 0x3ac   :  { %1503 = vmatprep.subr.bf16.mxu0 %v1262_v6  ;;  %1585 = vmatprep.subr.bf16.mxu1 %v1264_v8  ;;  %v1365_v6 = vld [vmem:[#allocation2 + $0x5c0] sm:$0xff]  ;;  %v1367_v8 = vld [vmem:[#allocation2 + $0x5d0] sm:$0xff] }
 0x3af   :  { %1504 = vmatpush1.bf16.msra.mxu0 %v1261_v63  ;;  %1586 = vmatpush1.bf16.msra.mxu1 %v1263_v3  ;;  %v1374_v63 = vld [vmem:[#allocation2 + $0x608] sm:$0xff]  ;;  %v1376_v3 = vld [vmem:[#allocation2 + $0x618] sm:$0xff] }
 0x3b0   :  { %1505 = vmatprep.subr.bf16.mxu0 %v1270_v0  ;;  %1587 = vmatprep.subr.bf16.mxu1 %v1272_v4  ;;  %v1373_v0 = vld [vmem:[#allocation2 + $0x600] sm:$0xff]  ;;  %v1375_v4 = vld [vmem:[#allocation2 + $0x610] sm:$0xff] }
 0x3b3   :  { %1506 = vmatpush1.bf16.msra.mxu0 %v1269_v10  ;;  %1588 = vmatpush1.bf16.msra.mxu1 %v1271_v11  ;;  %v1382_v10 = vld [vmem:[#allocation2 + $0x648] sm:$0xff]  ;;  %v1384_v11 = vld [vmem:[#allocation2 + $0x658] sm:$0xff] }
 0x3b4   :  { %1507 = vmatprep.subr.bf16.mxu0 %v1278_v12  ;;  %1589 = vmatprep.subr.bf16.mxu1 %v1280_v13  ;;  %v1381_v12 = vld [vmem:[#allocation2 + $0x640] sm:$0xff]  ;;  %v1383_v13 = vld [vmem:[#allocation2 + $0x650] sm:$0xff] }
 0x3b7   :  { %1508 = vmatpush1.bf16.msra.mxu0 %v1277_v14  ;;  %1590 = vmatpush1.bf16.msra.mxu1 %v1279_v15  ;;  %v1390_v14 = vld [vmem:[#allocation2 + $0x688] sm:$0xff]  ;;  %v1392_v15 = vld [vmem:[#allocation2 + $0x698] sm:$0xff] }
 0x3b8   :  { %1509 = vmatprep.subr.bf16.mxu0 %v1286_v16  ;;  %1591 = vmatprep.subr.bf16.mxu1 %v1288_v18  ;;  %v1389_v16 = vld [vmem:[#allocation2 + $0x680] sm:$0xff]  ;;  %v1391_v18 = vld [vmem:[#allocation2 + $0x690] sm:$0xff] }
 0x3bb   :  { %1510 = vmatpush1.bf16.msra.mxu0 %v1285_v22  ;;  %1592 = vmatpush1.bf16.msra.mxu1 %v1287_v24  ;;  %v1398_v22 = vld [vmem:[#allocation2 + $0x6c8] sm:$0xff]  ;;  %v1400_v24 = vld [vmem:[#allocation2 + $0x6d8] sm:$0xff] }
 0x3bc   :  { %1511 = vmatprep.subr.bf16.mxu0 %v1294_v25  ;;  %1593 = vmatprep.subr.bf16.mxu1 %v1296_v26  ;;  %v1397_v25 = vld [vmem:[#allocation2 + $0x6c0] sm:$0xff]  ;;  %v1399_v26 = vld [vmem:[#allocation2 + $0x6d0] sm:$0xff] }
 0x3bf   :  { %1512 = vmatpush1.bf16.msra.mxu0 %v1293_v27  ;;  %1594 = vmatpush1.bf16.msra.mxu1 %v1295_v28  ;;  %v1406_v27 = vld [vmem:[#allocation2 + $0x708] sm:$0xff]  ;;  %v1408_v28 = vld [vmem:[#allocation2 + $0x718] sm:$0xff] }
 0x3c0   :  { %1513 = vmatprep.subr.bf16.mxu0 %v1302_v29  ;;  %1595 = vmatprep.subr.bf16.mxu1 %v1304_v30  ;;  %v1405_v29 = vld [vmem:[#allocation2 + $0x700] sm:$0xff]  ;;  %v1407_v30 = vld [vmem:[#allocation2 + $0x710] sm:$0xff] }
 0x3c3   :  { %1514 = vmatpush1.bf16.msra.mxu0 %v1301_v31  ;;  %1596 = vmatpush1.bf16.msra.mxu1 %v1303_v32  ;;  %v1414_v31 = vld [vmem:[#allocation2 + $0x748] sm:$0xff]  ;;  %v1416_v32 = vld [vmem:[#allocation2 + $0x758] sm:$0xff] }
 0x3c4   :  { %1524 = vmatprep.subr.bf16.mxu0 %v1310_v35  ;;  %1606 = vmatprep.subr.bf16.mxu1 %v1312_v37  ;;  %v1413_v35 = vld [vmem:[#allocation2 + $0x740] sm:$0xff]  ;;  %v1415_v37 = vld [vmem:[#allocation2 + $0x750] sm:$0xff] }
 0x3c6   :  { %1516 = vmatmul.mubr.bf16.vlgmr.msra.gmra.mrb[8].mxu0 %v3295_v38  ;;  %1598 = vmatmul.mubr.bf16.vlgmr.msra.gmra.mrb[8].mxu1 %v3295_v38 }
 0x3c7   :  { %1525 = vmatpush1.bf16.msra.mxu0 %v1309_v39  ;;  %1607 = vmatpush1.bf16.msra.mxu1 %v1311_v41  ;;  %v1422_v39 = vld [vmem:[#allocation2 + $0x788] sm:$0xff]  ;;  %v1424_v41 = vld [vmem:[#allocation2 + $0x798] sm:$0xff] }
 0x3c8   :  { %1526 = vmatprep.subr.bf16.mxu0 %v1318_v43  ;;  %1608 = vmatprep.subr.bf16.mxu1 %v1320_v44  ;;  %v1421_v43 = vld [vmem:[#allocation2 + $0x780] sm:$0xff]  ;;  %v1423_v44 = vld [vmem:[#allocation2 + $0x790] sm:$0xff] }
 0x3c9   :  { %1556 = vmatprep.mubr.bf16.mxu0 %v3299_v45  ;;  %1638 = vmatprep.mubr.bf16.mxu1 %v3299_v45 }
 0x3cb   :  { %1527 = vmatpush1.bf16.msra.mxu0 %v1317_v17  ;;  %1609 = vmatpush1.bf16.msra.mxu1 %v1319_v46  ;;  %v1430_v17 = vld [vmem:[#allocation2 + $0x7c8] sm:$0xff]  ;;  %v1432_v46 = vld [vmem:[#allocation2 + $0x7d8] sm:$0xff] }
 0x3cc   :  { %1528 = vmatprep.subr.bf16.mxu0 %v1326_v47  ;;  %1610 = vmatprep.subr.bf16.mxu1 %v1328_v48  ;;  %v1429_v47 = vld [vmem:[#allocation2 + $0x7c0] sm:$0xff]  ;;  %v1431_v48 = vld [vmem:[#allocation2 + $0x7d0] sm:$0xff] }
 0x3cf   :  { %1529 = vmatpush1.bf16.msra.mxu0 %v1325_v20  ;;  %1611 = vmatpush1.bf16.msra.mxu1 %v1327_v49  ;;  %v1186_v20 = vld [vmem:[#allocation2 + $0x28] sm:$0xff]  ;;  %v1188_v49 = vld [vmem:[#allocation2 + $0x38] sm:$0xff] }
 0x3d0   :  { %1530 = vmatprep.subr.bf16.mxu0 %v1334_v50  ;;  %1612 = vmatprep.subr.bf16.mxu1 %v1336_v51  ;;  %v3307_v50 = vpack.c.bf16 %v3285_v19, %v3285_v19  ;;  %v1185_v51 = vld [vmem:[#allocation2 + $0x20] sm:$0xff]  ;;  %v1202_v19 = vld [vmem:[#allocation2 + $0xa8] sm:$0xff] }
 0x3d3   :  { %1531 = vmatpush1.bf16.msra.mxu0 %v1333_v52  ;;  %1613 = vmatpush1.bf16.msra.mxu1 %v1335_v53  ;;  %v1187_v52 = vld [vmem:[#allocation2 + $0x30] sm:$0xff]  ;;  %v1194_v53 = vld [vmem:[#allocation2 + $0x68] sm:$0xff] }
 0x3d4   :  { %1532 = vmatprep.subr.bf16.mxu0 %v1342_v54  ;;  %1614 = vmatprep.subr.bf16.mxu1 %v1344_v42  ;;  %v1196_v54 = vld [vmem:[#allocation2 + $0x78] sm:$0xff]  ;;  %v1193_v42 = vld [vmem:[#allocation2 + $0x60] sm:$0xff] }
 0x3d7   :  { %1533 = vmatpush1.bf16.msra.mxu0 %v1341_v55  ;;  %1615 = vmatpush1.bf16.msra.mxu1 %v1343_v57  ;;  %v1195_v55 = vld [vmem:[#allocation2 + $0x70] sm:$0xff]  ;;  %v1204_v57 = vld [vmem:[#allocation2 + $0xb8] sm:$0xff] }
 0x3d8   :  { %1534 = vmatprep.subr.bf16.mxu0 %v1350_v58  ;;  %1616 = vmatprep.subr.bf16.mxu1 %v1352_v59  ;;  %v1201_v58 = vld [vmem:[#allocation2 + $0xa0] sm:$0xff]  ;;  %v1203_v59 = vld [vmem:[#allocation2 + $0xb0] sm:$0xff] }
 0x3db   :  { %1535 = vmatpush1.bf16.msra.mxu0 %v1349_v60  ;;  %1617 = vmatpush1.bf16.msra.mxu1 %v1351_v61  ;;  %v1210_v60 = vld [vmem:[#allocation2 + $0xe8] sm:$0xff]  ;;  %v1212_v61 = vld [vmem:[#allocation2 + $0xf8] sm:$0xff] }
 0x3dc   :  { %1536 = vmatprep.subr.bf16.mxu0 %v1358_v62  ;;  %1618 = vmatprep.subr.bf16.mxu1 %v1360_v1  ;;  %v1209_v62 = vld [vmem:[#allocation2 + $0xe0] sm:$0xff]  ;;  %v1211_v1 = vld [vmem:[#allocation2 + $0xf0] sm:$0xff] }
 0x3df   :  { %1537 = vmatpush1.bf16.msra.mxu0 %v1357_v5  ;;  %1619 = vmatpush1.bf16.msra.mxu1 %v1359_v7  ;;  %v1218_v5 = vld [vmem:[#allocation2 + $0x128] sm:$0xff]  ;;  %v1220_v7 = vld [vmem:[#allocation2 + $0x138] sm:$0xff] }
 0x3e0   :  { %1538 = vmatprep.subr.bf16.mxu0 %v1366_v9  ;;  %1620 = vmatprep.subr.bf16.mxu1 %v1368_v2  ;;  %v1219_v9 = vld [vmem:[#allocation2 + $0x130] sm:$0xff]  ;;  %v1226_v2 = vld [vmem:[#allocation2 + $0x168] sm:$0xff] }
 0x3e3   :  { %1539 = vmatpush1.bf16.msra.mxu0 %v1365_v6  ;;  %1621 = vmatpush1.bf16.msra.mxu1 %v1367_v8  ;;  %v1228_v6 = vld [vmem:[#allocation2 + $0x178] sm:$0xff]  ;;  %v1225_v8 = vld [vmem:[#allocation2 + $0x160] sm:$0xff] }
 0x3e4   :  { %1540 = vmatprep.subr.bf16.mxu0 %v1374_v63  ;;  %1622 = vmatprep.subr.bf16.mxu1 %v1376_v3  ;;  %v1227_v63 = vld [vmem:[#allocation2 + $0x170] sm:$0xff]  ;;  %v1234_v3 = vld [vmem:[#allocation2 + $0x1a8] sm:$0xff] }
 0x3e7   :  { %1541 = vmatpush1.bf16.msra.mxu0 %v1373_v0  ;;  %1623 = vmatpush1.bf16.msra.mxu1 %v1375_v4  ;;  %v1236_v0 = vld [vmem:[#allocation2 + $0x1b8] sm:$0xff]  ;;  %v1233_v4 = vld [vmem:[#allocation2 + $0x1a0] sm:$0xff] }
 0x3e8   :  { %1542 = vmatprep.subr.bf16.mxu0 %v1382_v10  ;;  %1624 = vmatprep.subr.bf16.mxu1 %v1384_v11  ;;  %v1235_v10 = vld [vmem:[#allocation2 + $0x1b0] sm:$0xff]  ;;  %v1242_v11 = vld [vmem:[#allocation2 + $0x1e8] sm:$0xff] }
 0x3eb   :  { %1543 = vmatpush1.bf16.msra.mxu0 %v1381_v12  ;;  %1625 = vmatpush1.bf16.msra.mxu1 %v1383_v13  ;;  %v1244_v12 = vld [vmem:[#allocation2 + $0x1f8] sm:$0xff]  ;;  %v1241_v13 = vld [vmem:[#allocation2 + $0x1e0] sm:$0xff] }
 0x3ec   :  { %1544 = vmatprep.subr.bf16.mxu0 %v1390_v14  ;;  %1626 = vmatprep.subr.bf16.mxu1 %v1392_v15  ;;  %v1243_v14 = vld [vmem:[#allocation2 + $0x1f0] sm:$0xff]  ;;  %v1250_v15 = vld [vmem:[#allocation2 + $0x228] sm:$0xff] }
 0x3ef   :  { %1545 = vmatpush1.bf16.msra.mxu0 %v1389_v16  ;;  %1627 = vmatpush1.bf16.msra.mxu1 %v1391_v18  ;;  %v1252_v16 = vld [vmem:[#allocation2 + $0x238] sm:$0xff]  ;;  %v1249_v18 = vld [vmem:[#allocation2 + $0x220] sm:$0xff] }
 0x3f0   :  { %1546 = vmatprep.subr.bf16.mxu0 %v1398_v22  ;;  %1628 = vmatprep.subr.bf16.mxu1 %v1400_v24  ;;  %v1251_v22 = vld [vmem:[#allocation2 + $0x230] sm:$0xff]  ;;  %v1258_v24 = vld [vmem:[#allocation2 + $0x268] sm:$0xff] }
 0x3f3   :  { %1547 = vmatpush1.bf16.msra.mxu0 %v1397_v25  ;;  %1629 = vmatpush1.bf16.msra.mxu1 %v1399_v26  ;;  %v1260_v25 = vld [vmem:[#allocation2 + $0x278] sm:$0xff]  ;;  %v1257_v26 = vld [vmem:[#allocation2 + $0x260] sm:$0xff] }
 0x3f4   :  { %1548 = vmatprep.subr.bf16.mxu0 %v1406_v27  ;;  %1630 = vmatprep.subr.bf16.mxu1 %v1408_v28  ;;  %v1259_v27 = vld [vmem:[#allocation2 + $0x270] sm:$0xff]  ;;  %v1266_v28 = vld [vmem:[#allocation2 + $0x2a8] sm:$0xff] }
 0x3f7   :  { %1549 = vmatpush1.bf16.msra.mxu0 %v1405_v29  ;;  %1631 = vmatpush1.bf16.msra.mxu1 %v1407_v30  ;;  %v1268_v29 = vld [vmem:[#allocation2 + $0x2b8] sm:$0xff]  ;;  %v1265_v30 = vld [vmem:[#allocation2 + $0x2a0] sm:$0xff] }
 0x3f8   :  { %1550 = vmatprep.subr.bf16.mxu0 %v1414_v31  ;;  %1632 = vmatprep.subr.bf16.mxu1 %v1416_v32  ;;  %v1267_v31 = vld [vmem:[#allocation2 + $0x2b0] sm:$0xff]  ;;  %v1274_v32 = vld [vmem:[#allocation2 + $0x2e8] sm:$0xff] }
 0x3fb   :  { %1551 = vmatpush1.bf16.msra.mxu0 %v1413_v35  ;;  %1633 = vmatpush1.bf16.msra.mxu1 %v1415_v37  ;;  %v1276_v35 = vld [vmem:[#allocation2 + $0x2f8] sm:$0xff]  ;;  %v1273_v37 = vld [vmem:[#allocation2 + $0x2e0] sm:$0xff] }
 0x3fc   :  { %1552 = vmatprep.subr.bf16.mxu0 %v1422_v39  ;;  %1634 = vmatprep.subr.bf16.mxu1 %v1424_v41  ;;  %v1275_v39 = vld [vmem:[#allocation2 + $0x2f0] sm:$0xff]  ;;  %v1282_v41 = vld [vmem:[#allocation2 + $0x328] sm:$0xff] }
 0x3ff   :  { %1553 = vmatpush1.bf16.msra.mxu0 %v1421_v43  ;;  %1635 = vmatpush1.bf16.msra.mxu1 %v1423_v44  ;;  %v1284_v43 = vld [vmem:[#allocation2 + $0x338] sm:$0xff]  ;;  %v1281_v44 = vld [vmem:[#allocation2 + $0x320] sm:$0xff] }
 0x400   :  { %1554 = vmatprep.subr.bf16.mxu0 %v1430_v17  ;;  %1636 = vmatprep.subr.bf16.mxu1 %v1432_v46  ;;  %v1283_v17 = vld [vmem:[#allocation2 + $0x330] sm:$0xff]  ;;  %v1290_v46 = vld [vmem:[#allocation2 + $0x368] sm:$0xff] }
 0x403   :  { %1555 = vmatpush1.bf16.msra.mxu0 %v1429_v47  ;;  %1637 = vmatpush1.bf16.msra.mxu1 %v1431_v48  ;;  %v1292_v47 = vld [vmem:[#allocation2 + $0x378] sm:$0xff]  ;;  %v1289_v48 = vld [vmem:[#allocation2 + $0x360] sm:$0xff] }
 0x404   :  { %1647 = vmatprep.subr.bf16.mxu0 %v1186_v20  ;;  %1729 = vmatprep.subr.bf16.mxu1 %v1188_v49  ;;  %v1291_v20 = vld [vmem:[#allocation2 + $0x370] sm:$0xff]  ;;  %v1298_v49 = vld [vmem:[#allocation2 + $0x3a8] sm:$0xff] }
 0x406   :  { %1557 = vmatmul.mubr.bf16.vlgmr.msra.gmra.mrb[8].mxu0 %v3307_v50  ;;  %1639 = vmatmul.mubr.bf16.vlgmr.msra.gmra.mrb[8].mxu1 %v3307_v50 }
 0x407   :  { %1648 = vmatpush1.bf16.msra.mxu0 %v1185_v51  ;;  %1730 = vmatpush1.bf16.msra.mxu1 %v1187_v52  ;;  %v1300_v51 = vld [vmem:[#allocation2 + $0x3b8] sm:$0xff]  ;;  %v1297_v52 = vld [vmem:[#allocation2 + $0x3a0] sm:$0xff] }
 0x408   :  { %1649 = vmatprep.subr.bf16.mxu0 %v1194_v53  ;;  %1731 = vmatprep.subr.bf16.mxu1 %v1196_v54  ;;  %v1299_v53 = vld [vmem:[#allocation2 + $0x3b0] sm:$0xff]  ;;  %v1306_v54 = vld [vmem:[#allocation2 + $0x3e8] sm:$0xff] }
 0x409   :  { %1679 = vmatprep.mubr.bf16.mxu0 %v3289_v21  ;;  %1761 = vmatprep.mubr.bf16.mxu1 %v3289_v21  ;;  %v1217_v21 = vld [vmem:[#allocation2 + $0x120] sm:$0xff] }
 0x40b   :  { %1650 = vmatpush1.bf16.msra.mxu0 %v1193_v42  ;;  %1732 = vmatpush1.bf16.msra.mxu1 %v1195_v55  ;;  %v1308_v42 = vld [vmem:[#allocation2 + $0x3f8] sm:$0xff]  ;;  %v1305_v55 = vld [vmem:[#allocation2 + $0x3e0] sm:$0xff] }
 0x40c   :  { %1651 = vmatprep.subr.bf16.mxu0 %v1202_v19  ;;  %1733 = vmatprep.subr.bf16.mxu1 %v1204_v57  ;;  %v1307_v19 = vld [vmem:[#allocation2 + $0x3f0] sm:$0xff]  ;;  %v1314_v57 = vld [vmem:[#allocation2 + $0x428] sm:$0xff] }
 0x40f   :  { %1652 = vmatpush1.bf16.msra.mxu0 %v1201_v58  ;;  %1734 = vmatpush1.bf16.msra.mxu1 %v1203_v59  ;;  %v1316_v58 = vld [vmem:[#allocation2 + $0x438] sm:$0xff]  ;;  %v1313_v59 = vld [vmem:[#allocation2 + $0x420] sm:$0xff] }
 0x410   :  { %1653 = vmatprep.subr.bf16.mxu0 %v1210_v60  ;;  %1735 = vmatprep.subr.bf16.mxu1 %v1212_v61  ;;  %v1315_v60 = vld [vmem:[#allocation2 + $0x430] sm:$0xff]  ;;  %v1322_v61 = vld [vmem:[#allocation2 + $0x468] sm:$0xff] }
 0x413   :  { %1654 = vmatpush1.bf16.msra.mxu0 %v1209_v62  ;;  %1736 = vmatpush1.bf16.msra.mxu1 %v1211_v1  ;;  %v1324_v62 = vld [vmem:[#allocation2 + $0x478] sm:$0xff]  ;;  %v1321_v1 = vld [vmem:[#allocation2 + $0x460] sm:$0xff] }
 0x414   :  { %1655 = vmatprep.subr.bf16.mxu0 %v1218_v5  ;;  %1737 = vmatprep.subr.bf16.mxu1 %v1220_v7  ;;  %v1323_v5 = vld [vmem:[#allocation2 + $0x470] sm:$0xff]  ;;  %v1330_v7 = vld [vmem:[#allocation2 + $0x4a8] sm:$0xff] }
 0x417   :  { %1656 = vmatpush1.bf16.msra.mxu0 %v1217_v21  ;;  %1738 = vmatpush1.bf16.msra.mxu1 %v1219_v9  ;;  %v1332_v21 = vld [vmem:[#allocation2 + $0x4b8] sm:$0xff]  ;;  %v1329_v9 = vld [vmem:[#allocation2 + $0x4a0] sm:$0xff] }
 0x418   :  { %1657 = vmatprep.subr.bf16.mxu0 %v1226_v2  ;;  %1739 = vmatprep.subr.bf16.mxu1 %v1228_v6  ;;  %v1331_v2 = vld [vmem:[#allocation2 + $0x4b0] sm:$0xff]  ;;  %v1338_v6 = vld [vmem:[#allocation2 + $0x4e8] sm:$0xff] }
 0x41b   :  { %1658 = vmatpush1.bf16.msra.mxu0 %v1225_v8  ;;  %1740 = vmatpush1.bf16.msra.mxu1 %v1227_v63  ;;  %v1337_v8 = vld [vmem:[#allocation2 + $0x4e0] sm:$0xff]  ;;  %v1339_v63 = vld [vmem:[#allocation2 + $0x4f0] sm:$0xff] }
 0x41c   :  { %1659 = vmatprep.subr.bf16.mxu0 %v1234_v3  ;;  %1741 = vmatprep.subr.bf16.mxu1 %v1236_v0  ;;  %v1346_v3 = vld [vmem:[#allocation2 + $0x528] sm:$0xff]  ;;  %v1348_v0 = vld [vmem:[#allocation2 + $0x538] sm:$0xff] }
 0x41f   :  { %1660 = vmatpush1.bf16.msra.mxu0 %v1233_v4  ;;  %1742 = vmatpush1.bf16.msra.mxu1 %v1235_v10  ;;  %v1347_v4 = vld [vmem:[#allocation2 + $0x530] sm:$0xff]  ;;  %v1354_v10 = vld [vmem:[#allocation2 + $0x568] sm:$0xff] }
 0x420   :  { %1661 = vmatprep.subr.bf16.mxu0 %v1242_v11  ;;  %1743 = vmatprep.subr.bf16.mxu1 %v1244_v12  ;;  %v1356_v11 = vld [vmem:[#allocation2 + $0x578] sm:$0xff]  ;;  %v1353_v12 = vld [vmem:[#allocation2 + $0x560] sm:$0xff] }
 0x423   :  { %1662 = vmatpush1.bf16.msra.mxu0 %v1241_v13  ;;  %1744 = vmatpush1.bf16.msra.mxu1 %v1243_v14  ;;  %v1355_v13 = vld [vmem:[#allocation2 + $0x570] sm:$0xff]  ;;  %v1362_v14 = vld [vmem:[#allocation2 + $0x5a8] sm:$0xff] }
 0x424   :  { %1663 = vmatprep.subr.bf16.mxu0 %v1250_v15  ;;  %1745 = vmatprep.subr.bf16.mxu1 %v1252_v16  ;;  %v1364_v15 = vld [vmem:[#allocation2 + $0x5b8] sm:$0xff]  ;;  %v1361_v16 = vld [vmem:[#allocation2 + $0x5a0] sm:$0xff] }
 0x427   :  { %1664 = vmatpush1.bf16.msra.mxu0 %v1249_v18  ;;  %1746 = vmatpush1.bf16.msra.mxu1 %v1251_v22  ;;  %v1363_v18 = vld [vmem:[#allocation2 + $0x5b0] sm:$0xff]  ;;  %v1370_v22 = vld [vmem:[#allocation2 + $0x5e8] sm:$0xff] }
 0x428   :  { %1665 = vmatprep.subr.bf16.mxu0 %v1258_v24  ;;  %1747 = vmatprep.subr.bf16.mxu1 %v1260_v25  ;;  %v1372_v24 = vld [vmem:[#allocation2 + $0x5f8] sm:$0xff]  ;;  %v1369_v25 = vld [vmem:[#allocation2 + $0x5e0] sm:$0xff] }
 0x42b   :  { %1666 = vmatpush1.bf16.msra.mxu0 %v1257_v26  ;;  %1748 = vmatpush1.bf16.msra.mxu1 %v1259_v27  ;;  %v1371_v26 = vld [vmem:[#allocation2 + $0x5f0] sm:$0xff]  ;;  %v1378_v27 = vld [vmem:[#allocation2 + $0x628] sm:$0xff] }
 0x42c   :  { %1667 = vmatprep.subr.bf16.mxu0 %v1266_v28  ;;  %1749 = vmatprep.subr.bf16.mxu1 %v1268_v29  ;;  %v1380_v28 = vld [vmem:[#allocation2 + $0x638] sm:$0xff]  ;;  %v1377_v29 = vld [vmem:[#allocation2 + $0x620] sm:$0xff] }
 0x42f   :  { %1668 = vmatpush1.bf16.msra.mxu0 %v1265_v30  ;;  %1750 = vmatpush1.bf16.msra.mxu1 %v1267_v31  ;;  %v1379_v30 = vld [vmem:[#allocation2 + $0x630] sm:$0xff]  ;;  %v1386_v31 = vld [vmem:[#allocation2 + $0x668] sm:$0xff] }
 0x430   :  { %1669 = vmatprep.subr.bf16.mxu0 %v1274_v32  ;;  %1751 = vmatprep.subr.bf16.mxu1 %v1276_v35  ;;  %v1388_v32 = vld [vmem:[#allocation2 + $0x678] sm:$0xff]  ;;  %v1385_v35 = vld [vmem:[#allocation2 + $0x660] sm:$0xff] }
 0x433   :  { %1670 = vmatpush1.bf16.msra.mxu0 %v1273_v37  ;;  %1752 = vmatpush1.bf16.msra.mxu1 %v1275_v39  ;;  %v1387_v37 = vld [vmem:[#allocation2 + $0x670] sm:$0xff]  ;;  %v1394_v39 = vld [vmem:[#allocation2 + $0x6a8] sm:$0xff] }
 0x434   :  { %1671 = vmatprep.subr.bf16.mxu0 %v1282_v41  ;;  %1753 = vmatprep.subr.bf16.mxu1 %v1284_v43  ;;  %v1396_v41 = vld [vmem:[#allocation2 + $0x6b8] sm:$0xff]  ;;  %v1393_v43 = vld [vmem:[#allocation2 + $0x6a0] sm:$0xff] }
 0x437   :  { %1672 = vmatpush1.bf16.msra.mxu0 %v1281_v44  ;;  %1754 = vmatpush1.bf16.msra.mxu1 %v1283_v17  ;;  %v1395_v44 = vld [vmem:[#allocation2 + $0x6b0] sm:$0xff]  ;;  %v1402_v17 = vld [vmem:[#allocation2 + $0x6e8] sm:$0xff] }
 0x438   :  { %1673 = vmatprep.subr.bf16.mxu0 %v1290_v46  ;;  %1755 = vmatprep.subr.bf16.mxu1 %v1292_v47  ;;  %v1404_v46 = vld [vmem:[#allocation2 + $0x6f8] sm:$0xff]  ;;  %v1401_v47 = vld [vmem:[#allocation2 + $0x6e0] sm:$0xff] }
 0x43b   :  { %1674 = vmatpush1.bf16.msra.mxu0 %v1289_v48  ;;  %1756 = vmatpush1.bf16.msra.mxu1 %v1291_v20  ;;  %v1403_v48 = vld [vmem:[#allocation2 + $0x6f0] sm:$0xff]  ;;  %v1410_v20 = vld [vmem:[#allocation2 + $0x728] sm:$0xff] }
 0x43c   :  { %1675 = vmatprep.subr.bf16.mxu0 %v1298_v49  ;;  %1757 = vmatprep.subr.bf16.mxu1 %v1300_v51  ;;  %v1412_v49 = vld [vmem:[#allocation2 + $0x738] sm:$0xff]  ;;  %v1409_v51 = vld [vmem:[#allocation2 + $0x720] sm:$0xff] }
 0x43f   :  { %1676 = vmatpush1.bf16.msra.mxu0 %v1297_v52  ;;  %1758 = vmatpush1.bf16.msra.mxu1 %v1299_v53  ;;  %v1411_v52 = vld [vmem:[#allocation2 + $0x730] sm:$0xff]  ;;  %v1418_v53 = vld [vmem:[#allocation2 + $0x768] sm:$0xff] }
 0x440   :  { %1677 = vmatprep.subr.bf16.mxu0 %v1306_v54  ;;  %1759 = vmatprep.subr.bf16.mxu1 %v1308_v42  ;;  %v1420_v54 = vld [vmem:[#allocation2 + $0x778] sm:$0xff]  ;;  %v1417_v42 = vld [vmem:[#allocation2 + $0x760] sm:$0xff] }
 0x443   :  { %1678 = vmatpush1.bf16.msra.mxu0 %v1305_v55  ;;  %1760 = vmatpush1.bf16.msra.mxu1 %v1307_v19  ;;  %v1419_v55 = vld [vmem:[#allocation2 + $0x770] sm:$0xff]  ;;  %v1426_v19 = vld [vmem:[#allocation2 + $0x7a8] sm:$0xff] }
 0x444   :  { %1688 = vmatprep.subr.bf16.mxu0 %v1314_v57  ;;  %1770 = vmatprep.subr.bf16.mxu1 %v1316_v58  ;;  %v1428_v57 = vld [vmem:[#allocation2 + $0x7b8] sm:$0xff]  ;;  %v1425_v58 = vld [vmem:[#allocation2 + $0x7a0] sm:$0xff] }
 0x446   :  { %1680 = vmatmul.mubr.bf16.vlgmr.msra.gmra.mrb[12].mxu0 %v3295_v38  ;;  %1762 = vmatmul.mubr.bf16.vlgmr.msra.gmra.mrb[12].mxu1 %v3295_v38  ;;  %v1340_v38 = vld [vmem:[#allocation2 + $0x4f8] sm:$0xff] }
 0x447   :  { %1689 = vmatpush1.bf16.msra.mxu0 %v1313_v59  ;;  %1771 = vmatpush1.bf16.msra.mxu1 %v1315_v60  ;;  %v1427_v59 = vld [vmem:[#allocation2 + $0x7b0] sm:$0xff]  ;;  %v1434_v60 = vld [vmem:[#allocation2 + $0x7e8] sm:$0xff] }
 0x448   :  { %1690 = vmatprep.subr.bf16.mxu0 %v1322_v61  ;;  %1772 = vmatprep.subr.bf16.mxu1 %v1324_v62  ;;  %v1436_v61 = vld [vmem:[#allocation2 + $0x7f8] sm:$0xff]  ;;  %v1433_v62 = vld [vmem:[#allocation2 + $0x7e0] sm:$0xff] }
 0x449   :  { %1720 = vmatprep.mubr.bf16.mxu0 %v3299_v45  ;;  %1802 = vmatprep.mubr.bf16.mxu1 %v3299_v45  ;;  %v1345_v45 = vld [vmem:[#allocation2 + $0x520] sm:$0xff] }
 0x44b   :  { %1691 = vmatpush1.bf16.msra.mxu0 %v1321_v1  ;;  %1773 = vmatpush1.bf16.msra.mxu1 %v1323_v5  ;;  %v1435_v1 = vld [vmem:[#allocation2 + $0x7f0] sm:$0xff] }
 0x44c   :  { %1692 = vmatprep.subr.bf16.mxu0 %v1330_v7  ;;  %1774 = vmatprep.subr.bf16.mxu1 %v1332_v21  ;;  %v3319_v5 = vld [vmem:[#allocation13 + $0x13] sm:$0xff] }
 0x44d   :  { %v1446_v7 = vrot.slane %v3319_v5, %v3201_v34  ;;  %v1454_v21 = vrot.slane %v3319_v5, %v3232_v40 }
 0x44f   :  { %1693 = vmatpush1.bf16.msra.mxu0 %v1329_v9  ;;  %1775 = vmatpush1.bf16.msra.mxu1 %v1331_v2  ;;  %v1450_v9 = vrot.slane %v3319_v5, %v3204_v36  ;;  %v1458_v2 = vrot.slane %v3319_v5, %v3235_v56 }
 0x450   :  { %1694 = vmatprep.subr.bf16.mxu0 %v1338_v6  ;;  %1776 = vmatprep.subr.bf16.mxu1 %v1340_v38 }
 0x453   :  { %1695 = vmatpush1.bf16.msra.mxu0 %v1337_v8  ;;  %1777 = vmatpush1.bf16.msra.mxu1 %v1339_v63 }
 0x454   :  { %1696 = vmatprep.subr.bf16.mxu0 %v1346_v3  ;;  %1778 = vmatprep.subr.bf16.mxu1 %v1348_v0 }
 0x457   :  { %1697 = vmatpush1.bf16.msra.mxu0 %v1345_v45  ;;  %1779 = vmatpush1.bf16.msra.mxu1 %v1347_v4 }
 0x458   :  { %1698 = vmatprep.subr.bf16.mxu0 %v1354_v10  ;;  %1780 = vmatprep.subr.bf16.mxu1 %v1356_v11 }
 0x45b   :  { %1699 = vmatpush1.bf16.msra.mxu0 %v1353_v12  ;;  %1781 = vmatpush1.bf16.msra.mxu1 %v1355_v13 }
 0x45c   :  { %1700 = vmatprep.subr.bf16.mxu0 %v1362_v14  ;;  %1782 = vmatprep.subr.bf16.mxu1 %v1364_v15 }
 0x45f   :  { %1701 = vmatpush1.bf16.msra.mxu0 %v1361_v16  ;;  %1783 = vmatpush1.bf16.msra.mxu1 %v1363_v18 }
 0x460   :  { %1702 = vmatprep.subr.bf16.mxu0 %v1370_v22  ;;  %1784 = vmatprep.subr.bf16.mxu1 %v1372_v24 }
 0x463   :  { %1703 = vmatpush1.bf16.msra.mxu0 %v1369_v25  ;;  %1785 = vmatpush1.bf16.msra.mxu1 %v1371_v26 }
 0x464   :  { %1704 = vmatprep.subr.bf16.mxu0 %v1378_v27  ;;  %1786 = vmatprep.subr.bf16.mxu1 %v1380_v28 }
 0x467   :  { %1705 = vmatpush1.bf16.msra.mxu0 %v1377_v29  ;;  %1787 = vmatpush1.bf16.msra.mxu1 %v1379_v30 }
 0x468   :  { %1706 = vmatprep.subr.bf16.mxu0 %v1386_v31  ;;  %1788 = vmatprep.subr.bf16.mxu1 %v1388_v32 }
 0x46b   :  { %1707 = vmatpush1.bf16.msra.mxu0 %v1385_v35  ;;  %1789 = vmatpush1.bf16.msra.mxu1 %v1387_v37 }
 0x46c   :  { %1708 = vmatprep.subr.bf16.mxu0 %v1394_v39  ;;  %1790 = vmatprep.subr.bf16.mxu1 %v1396_v41 }
 0x46f   :  { %1709 = vmatpush1.bf16.msra.mxu0 %v1393_v43  ;;  %1791 = vmatpush1.bf16.msra.mxu1 %v1395_v44 }
 0x470   :  { %1710 = vmatprep.subr.bf16.mxu0 %v1402_v17  ;;  %1792 = vmatprep.subr.bf16.mxu1 %v1404_v46 }
 0x473   :  { %1711 = vmatpush1.bf16.msra.mxu0 %v1401_v47  ;;  %1793 = vmatpush1.bf16.msra.mxu1 %v1403_v48 }
 0x474   :  { %1712 = vmatprep.subr.bf16.mxu0 %v1410_v20  ;;  %1794 = vmatprep.subr.bf16.mxu1 %v1412_v49 }
 0x477   :  { %1713 = vmatpush1.bf16.msra.mxu0 %v1409_v51  ;;  %1795 = vmatpush1.bf16.msra.mxu1 %v1411_v52 }
 0x478   :  { %1714 = vmatprep.subr.bf16.mxu0 %v1418_v53  ;;  %1796 = vmatprep.subr.bf16.mxu1 %v1420_v54 }
 0x47b   :  { %1715 = vmatpush1.bf16.msra.mxu0 %v1417_v42  ;;  %1797 = vmatpush1.bf16.msra.mxu1 %v1419_v55 }
 0x47c   :  { %1716 = vmatprep.subr.bf16.mxu0 %v1426_v19  ;;  %1798 = vmatprep.subr.bf16.mxu1 %v1428_v57 }
 0x47f   :  { %1717 = vmatpush1.bf16.msra.mxu0 %v1425_v58  ;;  %1799 = vmatpush1.bf16.msra.mxu1 %v1427_v59 }
 0x480   :  { %1718 = vmatprep.subr.bf16.mxu0 %v1434_v60  ;;  %1800 = vmatprep.subr.bf16.mxu1 %v1436_v61 }
 0x483   :  { %1719 = vmatpush1.bf16.msra.mxu0 %v1433_v62  ;;  %1801 = vmatpush1.bf16.msra.mxu1 %v1435_v1 }
 0x486   :  { %1721 = vmatmul.mubr.bf16.vlgmr.msra.gmra.mrb[12].mxu0 %v3307_v50  ;;  %1803 = vmatmul.mubr.bf16.vlgmr.msra.gmra.mrb[12].mxu1 %v3307_v50 }
 0x4d9   :  { %v1558_v6 = vpop.f32.mrb[8].mxu0  ;;  %v1640_v38 = vpop.f32.mrb[8].mxu1 }
 0x4da   :  { %v3329_v8 = vadd.f32 %v1558_v6, %v1446_v7  ;;  %v3331_v63 = vadd.f32 %v1640_v38, %v1454_v21  ;;  %v1560_v50 = vpop.f32.mrb[9].mxu0  ;;  %v1642_v3 = vpop.f32.mrb[9].mxu1 }
 0x4db   :  { %v3333_v0 = vadd.f32 %v1560_v50, %v1450_v9  ;;  %v3335_v45 = vadd.f32 %v1642_v3, %v1458_v2  ;;  %v1562_v4 = vpop.f32.mrb[10].mxu0  ;;  %v1644_v10 = vpop.f32.mrb[10].mxu1 }
 0x4dc   :  { %v1813_v11 = vrot.slane %v3329_v8, 4  ;;  %v1861_v12 = vmul.f32 %v3329_v8, %v3329_v8  ;;  %v1825_v13 = vrot.slane %v3331_v63, 4  ;;  %v1863_v14 = vmul.f32 %v3331_v63, %v3331_v63  ;;  %v1563_v15 = vpop.f32.mrb[11].mxu0  ;;  %v1645_v16 = vpop.f32.mrb[11].mxu1 }
 0x4dd   :  { %v1819_v18 = vrot.slane %v3333_v0, 4  ;;  %v1862_v22 = vmul.f32 %v3333_v0, %v3333_v0  ;;  %v1831_v24 = vrot.slane %v3335_v45, 4  ;;  %v1864_v25 = vmul.f32 %v3335_v45, %v3335_v45 }
 0x4de   :  { %v1814_v26 = vadd.f32 %v3329_v8, %v1813_v11  ;;  %v1869_v27 = vrot.slane %v1861_v12, 4  ;;  %v1826_v28 = vadd.f32 %v3331_v63, %v1825_v13  ;;  %v1881_v29 = vrot.slane %v1863_v14, 4 }
 0x4df   :  { %v1820_v30 = vadd.f32 %v3333_v0, %v1819_v18  ;;  %v1875_v31 = vrot.slane %v1862_v22, 4  ;;  %v1832_v32 = vadd.f32 %v3335_v45, %v1831_v24  ;;  %v1887_v35 = vrot.slane %v1864_v25, 4 }
 0x4e0   :  { %v1815_v37 = vrot.slane %v1814_v26, 2  ;;  %v1870_v39 = vadd.f32 %v1869_v27, %v1861_v12  ;;  %v1827_v41 = vrot.slane %v1826_v28, 2  ;;  %v1882_v43 = vadd.f32 %v1881_v29, %v1863_v14 }
 0x4e1   :  { %v1821_v44 = vrot.slane %v1820_v30, 2  ;;  %v1876_v17 = vadd.f32 %v1875_v31, %v1862_v22  ;;  %v1833_v46 = vrot.slane %v1832_v32, 2  ;;  %v1888_v47 = vadd.f32 %v1887_v35, %v1864_v25 }
 0x4e2   :  { %v1816_v48 = vadd.f32 %v1815_v37, %v1814_v26  ;;  %v1871_v20 = vrot.slane %v1870_v39, 2  ;;  %v1828_v49 = vadd.f32 %v1827_v41, %v1826_v28  ;;  %v1883_v51 = vrot.slane %v1882_v43, 2 }
 0x4e3   :  { %v1822_v52 = vadd.f32 %v1821_v44, %v1820_v30  ;;  %v1877_v53 = vrot.slane %v1876_v17, 2  ;;  %v1834_v54 = vadd.f32 %v1833_v46, %v1832_v32  ;;  %v1889_v42 = vrot.slane %v1888_v47, 2 }
 0x4e4   :  { %v1817_v55 = vrot.slane %v1816_v48, 1  ;;  %v1872_v19 = vadd.f32 %v1871_v20, %v1870_v39  ;;  %v1829_v57 = vrot.slane %v1828_v49, 1  ;;  %v1884_v58 = vadd.f32 %v1883_v51, %v1882_v43 }
 0x4e5   :  { %v1823_v59 = vrot.slane %v1822_v52, 1  ;;  %v1878_v60 = vadd.f32 %v1877_v53, %v1876_v17  ;;  %v1835_v61 = vrot.slane %v1834_v54, 1  ;;  %v1890_v62 = vadd.f32 %v1889_v42, %v1888_v47 }
 0x4e6   :  { %v1818_v1 = vadd.f32 %v1817_v55, %v1816_v48  ;;  %v1873_v7 = vrot.slane %v1872_v19, 1  ;;  %v1830_v21 = vadd.f32 %v1829_v57, %v1828_v49  ;;  %v1885_v9 = vrot.slane %v1884_v58, 1 }
 0x4e7   :  { %v1824_v2 = vadd.f32 %v1823_v59, %v1822_v52  ;;  %v1879_v6 = vrot.slane %v1878_v60, 1  ;;  %v1836_v38 = vadd.f32 %v1835_v61, %v1834_v54  ;;  %v1891_v50 = vrot.slane %v1890_v62, 1 }
 0x4e8   :  { %v1874_v3 = vadd.f32 %v1873_v7, %v1872_v19  ;;  %v3353_v4 = vmul.f32 0.125, %v1818_v1  ;;  %v1886_v10 = vadd.f32 %v1885_v9, %v1884_v58  ;;  %v3355_v11 = vmul.f32 0.125, %v1830_v21 }
 0x4e9   :  { %v1880_v12 = vadd.f32 %v1879_v6, %v1878_v60  ;;  %v3357_v13 = vmul.f32 0.125, %v1824_v2  ;;  %v1892_v14 = vadd.f32 %v1891_v50, %v1890_v62  ;;  %v3359_v15 = vmul.f32 0.125, %v1836_v38 }
 0x4ea   :  { %v1925_v16 = vmul.f32 0.125, %v1874_v3  ;;  %v1933_v18 = vmul.f32 %v3353_v4, %v3353_v4  ;;  %v1927_v22 = vmul.f32 0.125, %v1886_v10  ;;  %v1935_v24 = vmul.f32 %v3355_v11, %v3355_v11 }
 0x4eb   :  { %v1926_v25 = vmul.f32 0.125, %v1880_v12  ;;  %v1934_v26 = vmul.f32 %v3357_v13, %v3357_v13  ;;  %v1928_v27 = vmul.f32 0.125, %v1892_v14  ;;  %v1936_v28 = vmul.f32 %v3359_v15, %v3359_v15 }
 0x4ec   :  { %v1941_v29 = vsub.f32 %v1925_v16, %v1933_v18  ;;  %v1943_v30 = vsub.f32 %v1927_v22, %v1935_v24  ;;  %v3378_v55 = vsub.s32 4, %v3198_v33  ;;  %v3381_v19 = vsub.s32 6, %v3198_v33 }
 0x4ed   :  { %v1942_v31 = vsub.f32 %v1926_v25, %v1934_v26  ;;  %v1944_v32 = vsub.f32 %v1928_v27, %v1936_v28  ;;  %v3384_v57 = vsub.s32 5, %v3198_v33  ;;  %v3387_v58 = vsub.s32 7, %v3198_v33 }
 0x4ee   :  { %v1949_v35 = vmax.f32 %v1941_v29, 0.0  ;;  %v1951_v37 = vmax.f32 %v1943_v30, 0.0  ;;  %v1462_v59 = vrot.slane %v3319_v5, %v3378_v55  ;;  %v1470_v60 = vrot.slane %v3319_v5, %v3381_v19 }
 0x4ef   :  { %v1950_v39 = vmax.f32 %v1942_v31, 0.0  ;;  %v1952_v41 = vmax.f32 %v1944_v32, 0.0  ;;  %v1466_v61 = vrot.slane %v3319_v5, %v3384_v57  ;;  %v1474_v62 = vrot.slane %v3319_v5, %v3387_v58 }
 0x4f0   :  { %v1957_v43 = vadd.f32 0.8, %v1949_v35  ;;  %v1959_v44 = vadd.f32 0.8, %v1951_v37 }
 0x4f1   :  { %v1958_v17 = vadd.f32 0.8, %v1950_v39  ;;  %v1960_v46 = vadd.f32 0.8, %v1952_v41 }
 0x4f2   :  { %2870 = vrsqrt.f32 %v1957_v43 }
 0x4f3   :  { %2872 = vrsqrt.f32 %v1959_v44 }
 0x4f4   :  { %2874 = vrsqrt.f32 %v1958_v17 }
 0x4f5   :  { %2876 = vrsqrt.f32 %v1960_v46 }
 0x4fc   :  { %v2871_v47 = vpop.eup %2870 }
 0x4fd   :  { %v2873_v48 = vpop.eup %2872 }
 0x4fe   :  { %v2875_v20 = vpop.eup %2874 }
 0x4ff   :  { %v2877_v49 = vpop.eup %2876  ;;  %v1981_v51 = vcombine.low %v2871_v47, %v2875_v20 }
 0x500   :  { %v1982_v52 = vcombine.low %v2873_v48, %v2877_v49 }
 0x501   :  { %v3370_v53 = vrot.slane %v1981_v51, %v3209_v23 }
 0x502   :  { %v3373_v54 = vrot.slane %v1982_v52, %v3209_v23 }
 0x504   :  { %v2013_v42 = vcombine.low %v3370_v53, %v3373_v54 }
 0x559   :  { %v1722_v1 = vpop.f32.mrb[12].mxu0  ;;  %v1804_v7 = vpop.f32.mrb[12].mxu1 }
 0x55a   :  { %v3397_v21 = vadd.f32 %v1722_v1, %v1462_v59  ;;  %v3399_v9 = vadd.f32 %v1804_v7, %v1470_v60  ;;  %v1724_v33 = vpop.f32.mrb[13].mxu0  ;;  %v1806_v2 = vpop.f32.mrb[13].mxu1 }
 0x55b   :  { %v3401_v6 = vadd.f32 %v1724_v33, %v1466_v61  ;;  %v3403_v38 = vadd.f32 %v1806_v2, %v1474_v62  ;;  %v1726_v50 = vpop.f32.mrb[14].mxu0  ;;  %v1808_v3 = vpop.f32.mrb[14].mxu1 }
 0x55c   :  { %v1837_v10 = vrot.slane %v3397_v21, 4  ;;  %v1865_v12 = vmul.f32 %v3397_v21, %v3397_v21  ;;  %v1849_v5 = vrot.slane %v3399_v9, 4  ;;  %v1867_v14 = vmul.f32 %v3399_v9, %v3399_v9  ;;  %v1727_v16 = vpop.f32.mrb[15].mxu0  ;;  %v1809_v18 = vpop.f32.mrb[15].mxu1 }
 0x55d   :  { %v1843_v22 = vrot.slane %v3401_v6, 4  ;;  %v1866_v24 = vmul.f32 %v3401_v6, %v3401_v6  ;;  %v1855_v25 = vrot.slane %v3403_v38, 4  ;;  %v1868_v26 = vmul.f32 %v3403_v38, %v3403_v38 }
 0x55e   :  { %v1838_v27 = vadd.f32 %v3397_v21, %v1837_v10  ;;  %v1893_v28 = vrot.slane %v1865_v12, 4  ;;  %v1850_v29 = vadd.f32 %v3399_v9, %v1849_v5  ;;  %v1905_v30 = vrot.slane %v1867_v14, 4 }
 0x55f   :  { %v1844_v31 = vadd.f32 %v3401_v6, %v1843_v22  ;;  %v1899_v32 = vrot.slane %v1866_v24, 4  ;;  %v1856_v35 = vadd.f32 %v3403_v38, %v1855_v25  ;;  %v1911_v37 = vrot.slane %v1868_v26, 4 }
 0x560   :  { %v1839_v39 = vrot.slane %v1838_v27, 2  ;;  %v1894_v41 = vadd.f32 %v1893_v28, %v1865_v12  ;;  %v1851_v43 = vrot.slane %v1850_v29, 2  ;;  %v1906_v44 = vadd.f32 %v1905_v30, %v1867_v14 }
 0x561   :  { %v1845_v17 = vrot.slane %v1844_v31, 2  ;;  %v1900_v46 = vadd.f32 %v1899_v32, %v1866_v24  ;;  %v1857_v47 = vrot.slane %v1856_v35, 2  ;;  %v1912_v48 = vadd.f32 %v1911_v37, %v1868_v26 }
 0x562   :  { %v1840_v20 = vadd.f32 %v1839_v39, %v1838_v27  ;;  %v1895_v49 = vrot.slane %v1894_v41, 2  ;;  %v1852_v51 = vadd.f32 %v1851_v43, %v1850_v29  ;;  %v1907_v52 = vrot.slane %v1906_v44, 2 }
 0x563   :  { %v1846_v59 = vadd.f32 %v1845_v17, %v1844_v31  ;;  %v1901_v60 = vrot.slane %v1900_v46, 2  ;;  %v1858_v61 = vadd.f32 %v1857_v47, %v1856_v35  ;;  %v1913_v62 = vrot.slane %v1912_v48, 2 }
 0x564   :  { %v1841_v1 = vrot.slane %v1840_v20, 1  ;;  %v1896_v7 = vadd.f32 %v1895_v49, %v1894_v41  ;;  %v1853_v33 = vrot.slane %v1852_v51, 1  ;;  %v1908_v2 = vadd.f32 %v1907_v52, %v1906_v44 }
 0x565   :  { %v1847_v50 = vrot.slane %v1846_v59, 1  ;;  %v1902_v3 = vadd.f32 %v1901_v60, %v1900_v46  ;;  %v1859_v10 = vrot.slane %v1858_v61, 1  ;;  %v1914_v12 = vadd.f32 %v1913_v62, %v1912_v48 }
 0x566   :  { %v1842_v5 = vadd.f32 %v1841_v1, %v1840_v20  ;;  %v1897_v14 = vrot.slane %v1896_v7, 1  ;;  %v1854_v16 = vadd.f32 %v1853_v33, %v1852_v51  ;;  %v1909_v18 = vrot.slane %v1908_v2, 1 }
 0x567   :  { %v1848_v22 = vadd.f32 %v1847_v50, %v1846_v59  ;;  %v1903_v24 = vrot.slane %v1902_v3, 1  ;;  %v1860_v25 = vadd.f32 %v1859_v10, %v1858_v61  ;;  %v1915_v26 = vrot.slane %v1914_v12, 1 }
 0x568   :  { %v1898_v27 = vadd.f32 %v1897_v14, %v1896_v7  ;;  %v1921_v28 = vmul.f32 0.125, %v1842_v5  ;;  %v1910_v29 = vadd.f32 %v1909_v18, %v1908_v2  ;;  %v1923_v30 = vmul.f32 0.125, %v1854_v16 }
 0x569   :  { %v1904_v31 = vadd.f32 %v1903_v24, %v1902_v3  ;;  %v1922_v32 = vmul.f32 0.125, %v1848_v22  ;;  %v1916_v35 = vadd.f32 %v1915_v26, %v1914_v12  ;;  %v1924_v37 = vmul.f32 0.125, %v1860_v25  ;;  %v1811_v26 = vld [vmem:[#allocation13 + $0x1b] sm:$0xff] }
 0x56a   :  { %v1929_v39 = vmul.f32 0.125, %v1898_v27  ;;  %v1937_v41 = vmul.f32 %v1921_v28, %v1921_v28  ;;  %v1931_v43 = vmul.f32 0.125, %v1910_v29  ;;  %v1939_v44 = vmul.f32 %v1923_v30, %v1923_v30 }
 0x56b   :  { %v1930_v17 = vmul.f32 0.125, %v1904_v31  ;;  %v1938_v46 = vmul.f32 %v1922_v32, %v1922_v32  ;;  %v1932_v47 = vmul.f32 0.125, %v1916_v35  ;;  %v1940_v48 = vmul.f32 %v1924_v37, %v1924_v37 }
 0x56c   :  { %v1945_v20 = vsub.f32 %v1929_v39, %v1937_v41  ;;  %v1947_v49 = vsub.f32 %v1931_v43, %v1939_v44  ;;  %v2021_v24 = vrot.slane %v2013_v42, %v3209_v23 }
 0x56d   :  { %v1946_v51 = vsub.f32 %v1930_v17, %v1938_v46  ;;  %v1948_v52 = vsub.f32 %v1932_v47, %v1940_v48 }
 0x56e   :  { %v1953_v59 = vmax.f32 %v1945_v20, 0.0  ;;  %v1955_v60 = vmax.f32 %v1947_v49, 0.0 }
 0x56f   :  { %v1954_v61 = vmax.f32 %v1946_v51, 0.0  ;;  %v1956_v62 = vmax.f32 %v1948_v52, 0.0 }
 0x570   :  { %v1961_v1 = vadd.f32 0.8, %v1953_v59  ;;  %v1963_v7 = vadd.f32 0.8, %v1955_v60 }
 0x571   :  { %v1962_v33 = vadd.f32 0.8, %v1954_v61  ;;  %v1964_v2 = vadd.f32 0.8, %v1956_v62 }
 0x572   :  { %2878 = vrsqrt.f32 %v1961_v1 }
 0x573   :  { %2880 = vrsqrt.f32 %v1963_v7 }
 0x574   :  { %2882 = vrsqrt.f32 %v1962_v33 }
 0x575   :  { %2884 = vrsqrt.f32 %v1964_v2  ;;  %v1812_v2 = vld [vmem:[#allocation13 + $0x23] sm:$0xff] }
 0x57c   :  { %v2879_v50 = vpop.eup %2878 }
 0x57d   :  { %v2881_v3 = vpop.eup %2880 }
 0x57e   :  { %v2883_v10 = vpop.eup %2882 }
 0x57f   :  { %v2885_v12 = vpop.eup %2884  ;;  %v1983_v5 = vcombine.low %v2879_v50, %v2883_v10 }
 0x580   :  { %v1984_v14 = vcombine.low %v2881_v3, %v2885_v12 }
 0x581   :  { %v2005_v16 = vrot.slane %v1983_v5, %v3209_v23 }
 0x582   :  { %v2012_v18 = vrot.slane %v1984_v14, %v3209_v23 }
 0x584   :  { %v2014_v22 = vcombine.low %v2005_v16, %v2012_v18 }
 0x586   :  { %v2028_v25 = vrot.slane %v2014_v22, %v3209_v23 }
 0x588   :  { %v2029_v27 = vcombine.low %v2021_v24, %v2028_v25 }
 0x58a   :  { %v2031_v29 = vmul.f32 %v2029_v27, %v1811_v26 }
 0x58c   :  { %v2036_v31 = vrot.slane %v2031_v29, %v3201_v34  ;;  %v2040_v35 = vrot.slane %v2031_v29, %v3204_v36  ;;  %v2044_v39 = vrot.slane %v2031_v29, %v3232_v40  ;;  %v2048_v41 = vrot.slane %v2031_v29, %v3235_v56 }
 0x58d   :  { %v2052_v43 = vrot.slane %v2031_v29, %v3378_v55  ;;  %v2056_v44 = vrot.slane %v2031_v29, %v3384_v57  ;;  %v2060_v53 = vrot.slane %v2031_v29, %v3381_v19  ;;  %v2064_v54 = vrot.slane %v2031_v29, %v3387_v58 }
 0x58e   :  { %v2073_v42 = vmul.f32 %v2036_v31, %v3353_v4  ;;  %v2074_v17 = vmul.f32 %v2040_v35, %v3357_v13  ;;  %v2075_v46 = vmul.f32 %v2044_v39, %v3355_v11  ;;  %v2076_v47 = vmul.f32 %v2048_v41, %v3359_v15 }
 0x58f   :  { %v2077_v48 = vmul.f32 %v2052_v43, %v1921_v28  ;;  %v2078_v20 = vmul.f32 %v2056_v44, %v1922_v32  ;;  %v2079_v49 = vmul.f32 %v2060_v53, %v1923_v30  ;;  %v2080_v51 = vmul.f32 %v2064_v54, %v1924_v37 }
 0x590   :  { %v2089_v52 = vcombine.low %v2073_v42, %v2074_v17  ;;  %v2090_v59 = vcombine.low %v2075_v46, %v2076_v47  ;;  %v2140_v60 = vmul.f32 %v3329_v8, %v2036_v31  ;;  %v2141_v61 = vmul.f32 %v3333_v0, %v2040_v35 }
 0x591   :  { %v2091_v62 = vcombine.low %v2077_v48, %v2078_v20  ;;  %v2092_v1 = vcombine.low %v2079_v49, %v2080_v51  ;;  %v2142_v4 = vmul.f32 %v3331_v63, %v2044_v39  ;;  %v2143_v13 = vmul.f32 %v3335_v45, %v2048_v41 }
 0x592   :  { %v2099_v11 = vrot.slane %v2089_v52, %v3209_v23  ;;  %v2106_v15 = vrot.slane %v2090_v59, %v3209_v23  ;;  %v2144_v28 = vmul.f32 %v3397_v21, %v2052_v43  ;;  %v2145_v30 = vmul.f32 %v3401_v6, %v2056_v44 }
 0x593   :  { %v2113_v32 = vrot.slane %v2091_v62, %v3209_v23  ;;  %v2120_v8 = vrot.slane %v2092_v1, %v3209_v23  ;;  %v2146_v0 = vmul.f32 %v3399_v9, %v2060_v53  ;;  %v2147_v37 = vmul.f32 %v3403_v38, %v2064_v54 }
 0x594   :  { %v2121_v7 = vcombine.low %v2099_v11, %v2106_v15 }
 0x595   :  { %v2122_v63 = vcombine.low %v2113_v32, %v2120_v8 }
 0x596   :  { %v2129_v45 = vrot.slane %v2121_v7, %v3209_v23 }
 0x597   :  { %v2136_v33 = vrot.slane %v2122_v63, %v3209_v23 }
 0x599   :  { %v2137_v50 = vcombine.low %v2129_v45, %v2136_v33 }
 0x59b   :  { %v2139_v3 = vsub.f32 %v1812_v2, %v2137_v50 }
 0x59d   :  { %v2152_v21 = vrot.slane %v2139_v3, %v3201_v34  ;;  %v2156_v6 = vrot.slane %v2139_v3, %v3204_v36  ;;  %v2160_v10 = vrot.slane %v2139_v3, %v3232_v40  ;;  %v2164_v12 = vrot.slane %v2139_v3, %v3235_v56 }
 0x59e   :  { %v2168_v9 = vrot.slane %v2139_v3, %v3378_v55  ;;  %v2172_v38 = vrot.slane %v2139_v3, %v3384_v57  ;;  %v2176_v5 = vrot.slane %v2139_v3, %v3381_v19  ;;  %v2180_v14 = vrot.slane %v2139_v3, %v3387_v58 }
 0x59f   :  { %v2189_v23 = vadd.f32 %v2152_v21, %v2140_v60  ;;  %v2190_v16 = vadd.f32 %v2156_v6, %v2141_v61  ;;  %v2191_v18 = vadd.f32 %v2160_v10, %v2142_v4  ;;  %v2192_v22 = vadd.f32 %v2164_v12, %v2143_v13 }
 0x5a0   :  { %v2193_v24 = vadd.f32 %v2168_v9, %v2144_v28  ;;  %v2194_v34 = vadd.f32 %v2172_v38, %v2145_v30  ;;  %v2195_v25 = vadd.f32 %v2176_v5, %v2146_v0  ;;  %v2196_v36 = vadd.f32 %v2180_v14, %v2147_v37 }
 0x5a1   :  { %v2197_v26 = vmul.f32 0.2, %v2189_v23  ;;  %v2198_v40 = vmul.f32 0.2, %v2190_v16  ;;  %v2199_v27 = vmul.f32 0.2, %v2191_v18 }
 0x5a2   :  { %v2200_v56 = vmul.f32 0.2, %v2192_v22  ;;  %v2201_v29 = vmul.f32 0.2, %v2193_v24  ;;  %v2202_v55 = vmul.f32 0.2, %v2194_v34 }
 0x5a3   :  { %v2203_v31 = vmul.f32 0.2, %v2195_v25  ;;  %v2204_v57 = vmul.f32 0.2, %v2196_v36  ;;  %v3462_v35 = vmax.f32 %v2189_v23, %v2197_v26  ;;  %v2206_v19 = vmax.f32 %v2190_v16, %v2198_v40 }
 0x5a4   :  { %v3464_v58 = vmax.f32 %v2191_v18, %v2199_v27  ;;  %v2208_v39 = vmax.f32 %v2192_v22, %v2200_v56  ;;  %v3466_v41 = vmax.f32 %v2193_v24, %v2201_v29  ;;  %v3468_v43 = vmax.f32 %v2194_v34, %v2202_v55 }
 0x5a5   :  { %v3470_v44 = vmax.f32 %v2195_v25, %v2203_v31  ;;  %v3472_v53 = vmax.f32 %v2196_v36, %v2204_v57 }
 0x5a6   :  { %3050 = dma.done.wait [#allocation4 + $0x1], 8192 }
 0x5a7   :  { %3051 = vsyncadd [#allocation4 + $0x1], 4294959104  ;;  %v2283_v54 = vpack.c.bf16 %v2206_v19, %v2206_v19  ;;  %v2285_v42 = vpack.c.bf16 %v2208_v39, %v2208_v39  ;;  %v2226_v17 = vld [vmem:[#allocation3 + $0x40] sm:$0xff]  ;;  %v2227_v20 = vld [vmem:[#allocation3 + $0x48] sm:$0xff]  ;;  %v2282_v9 = vpack.c.bf16 %v3462_v35, %v3462_v35  ;;  %v2284_v38 = vpack.c.bf16 %v3464_v58, %v3464_v58  ;;  %s3076_s5 = smov [#allocation14]  }
 0x5a8   :  { %v2242_v46 = vld [vmem:[#allocation3 + $0xc0] sm:$0xff]  ;;  %2587 = vmatprep.subr.bf16.mxu0 %v2226_v17  ;;  %v2243_v49 = vld [vmem:[#allocation3 + $0xc8] sm:$0xff]  ;;  %v2228_v59 = vld [vmem:[#allocation3 + $0x50] sm:$0xff]  ;;  %v2287_v18 = vpack.c.bf16 %v3468_v43, %v3468_v43  ;;  %v2289_v22 = vpack.c.bf16 %v3472_v53, %v3472_v53  ;;  %s2467_s18 = sshll.u32 %s3076_s5, 4  ;;  %s2468_s18 = int_to_ptr.vmem [resolvable:$true] %s2467_s18 }
 0x5a9   :  { %2328 = vmatprep.mubr.bf16.mxu0 %v2283_v54  ;;  %2368 = vmatprep.mubr.bf16.mxu1 %v2285_v42  ;;  %v2218_v47 = vld [vmem:[#allocation3] sm:$0xff]  ;;  %v2219_v51 = vld [vmem:[#allocation3 + $0x8] sm:$0xff]  ;;  %v2244_v60 = vld [vmem:[#allocation3 + $0xd0] sm:$0xff]  ;;  %s3020_s3 = scalar_lea.vmem %s2468_s18, 128  ;;  %p3025_p7 = scmp.lt.s32.totalorder %s2468_s18, %s2468_s18 }
 0x5aa   :  { %2609 = vmatprep.subr.bf16.mxu1 %v2242_v46  ;;  %v2234_v48 = vld [vmem:[#allocation3 + $0x80] sm:$0xff]  ;;  %2588 = vmatpush3.bf16.msra.mxu0 %v2218_v47  ;;  %v2235_v52 = vld [vmem:[#allocation3 + $0x88] sm:$0xff]  ;;  %v2220_v61 = vld [vmem:[#allocation3 + $0x10] sm:$0xff]  ;;  %p3021_p6 = scmp.ne.s32.totalorder %s2468_s18, %s3020_s3  ;;  %p3026_p8 = scmp.lt.s32.totalorder %s3020_s3, %s3020_s3 }
 0x5ab   :  { %2610 = vmatpush3.bf16.msra.mxu1 %v2234_v48  ;;  %2589 = vmatprep.subr.bf16.mxu0 %v2227_v20  ;;  %v2236_v62 = vld [vmem:[#allocation3 + $0x90] sm:$0xff]  ;;  %v2229_v1 = vld [vmem:[#allocation3 + $0x58] sm:$0xff]  ;;  %v2230_v15 = vld [vmem:[#allocation3 + $0x60] sm:$0xff] }
 0x5ac   :  { %2611 = vmatprep.subr.bf16.mxu1 %v2243_v49  ;;  %v2245_v4 = vld [vmem:[#allocation3 + $0xd8] sm:$0xff]  ;;  %v2246_v28 = vld [vmem:[#allocation3 + $0xe0] sm:$0xff]  ;;  %v2231_v8 = vld [vmem:[#allocation3 + $0x68] sm:$0xff]  ;;  %p3027_p9 = por %p3026_p8, %p3025_p7 }
 0x5ad   :  { %v2221_v13 = vld [vmem:[#allocation3 + $0x18] sm:$0xff]  ;;  %v2222_v30 = vld [vmem:[#allocation3 + $0x20] sm:$0xff]  ;;  %v2247_v0 = vld [vmem:[#allocation3 + $0xe8] sm:$0xff] }
 0x5ae   :  { %2590 = vmatpush3.bf16.msra.mxu0 %v2219_v51  ;;  %v2237_v11 = vld [vmem:[#allocation3 + $0x98] sm:$0xff]  ;;  %v2238_v32 = vld [vmem:[#allocation3 + $0xa0] sm:$0xff]  ;;  %v2223_v37 = vld [vmem:[#allocation3 + $0x28] sm:$0xff]  ;;  %v2286_v51 = vpack.c.bf16 %v3466_v41, %v3466_v41  ;;  %p3028_p10 = pnand %p3027_p9, %p3021_p6 }
 0x5af   :  { %2612 = vmatpush3.bf16.msra.mxu1 %v2235_v52  ;;  %2591 = vmatprep.subr.bf16.mxu0 %v2228_v59  ;;  %v2239_v7 = vld [vmem:[#allocation3 + $0xa8] sm:$0xff]  ;;  %v2232_v63 = vld [vmem:[#allocation3 + $0x70] sm:$0xff]  ;;  %v2233_v50 = vld [vmem:[#allocation3 + $0x78] sm:$0xff]  ;;  %v2288_v52 = vpack.c.bf16 %v3470_v44, %v3470_v44 }
 0x5b0   :  { %2613 = vmatprep.subr.bf16.mxu1 %v2244_v60  ;;  %v2248_v45 = vld [vmem:[#allocation3 + $0xf0] sm:$0xff]  ;;  %v2249_v3 = vld [vmem:[#allocation3 + $0xf8] sm:$0xff]  ;;  %v2258_v10 = vld [vmem:[#allocation3 + $0x140] sm:$0xff] }
 0x5b1   :  { %v2224_v33 = vld [vmem:[#allocation3 + $0x30] sm:$0xff]  ;;  %v2225_v21 = vld [vmem:[#allocation3 + $0x38] sm:$0xff]  ;;  %v2274_v12 = vld [vmem:[#allocation3 + $0x1c0] sm:$0xff] }
 0x5b2   :  { %2592 = vmatpush3.bf16.msra.mxu0 %v2220_v61  ;;  %v2240_v2 = vld [vmem:[#allocation3 + $0xb0] sm:$0xff]  ;;  %v2241_v6 = vld [vmem:[#allocation3 + $0xb8] sm:$0xff]  ;;  %v2250_v5 = vld [vmem:[#allocation3 + $0x100] sm:$0xff] }
 0x5b3   :  { %2614 = vmatpush3.bf16.msra.mxu1 %v2236_v62  ;;  %2593 = vmatprep.subr.bf16.mxu0 %v2229_v1  ;;  %v2266_v14 = vld [vmem:[#allocation3 + $0x180] sm:$0xff]  ;;  %v2259_v23 = vld [vmem:[#allocation3 + $0x148] sm:$0xff]  ;;  %v2260_v25 = vld [vmem:[#allocation3 + $0x150] sm:$0xff] }
 0x5b4   :  { %2615 = vmatprep.subr.bf16.mxu1 %v2245_v4  ;;  %v2275_v16 = vld [vmem:[#allocation3 + $0x1c8] sm:$0xff]  ;;  %v2276_v36 = vld [vmem:[#allocation3 + $0x1d0] sm:$0xff]  ;;  %v2261_v27 = vld [vmem:[#allocation3 + $0x158] sm:$0xff] }
 0x5b5   :  { %v2251_v24 = vld [vmem:[#allocation3 + $0x108] sm:$0xff]  ;;  %v2252_v26 = vld [vmem:[#allocation3 + $0x110] sm:$0xff]  ;;  %v2277_v56 = vld [vmem:[#allocation3 + $0x1d8] sm:$0xff] }
 0x5b6   :  { %2594 = vmatpush3.bf16.msra.mxu0 %v2221_v13  ;;  %v2267_v34 = vld [vmem:[#allocation3 + $0x188] sm:$0xff]  ;;  %v2268_v40 = vld [vmem:[#allocation3 + $0x190] sm:$0xff]  ;;  %v2253_v29 = vld [vmem:[#allocation3 + $0x118] sm:$0xff] }
 0x5b7   :  { %2616 = vmatpush3.bf16.msra.mxu1 %v2237_v11  ;;  %2595 = vmatprep.subr.bf16.mxu0 %v2230_v15  ;;  %v2269_v55 = vld [vmem:[#allocation3 + $0x198] sm:$0xff]  ;;  %v2262_v31 = vld [vmem:[#allocation3 + $0x160] sm:$0xff]  ;;  %v2263_v58 = vld [vmem:[#allocation3 + $0x168] sm:$0xff] }
 0x5b8   :  { %2617 = vmatprep.subr.bf16.mxu1 %v2246_v28  ;;  %v2278_v57 = vld [vmem:[#allocation3 + $0x1e0] sm:$0xff]  ;;  %v2279_v39 = vld [vmem:[#allocation3 + $0x1e8] sm:$0xff]  ;;  %v2264_v54 = vld [vmem:[#allocation3 + $0x170] sm:$0xff] }
 0x5b9   :  { %v2254_v35 = vld [vmem:[#allocation3 + $0x120] sm:$0xff]  ;;  %v2255_v43 = vld [vmem:[#allocation3 + $0x128] sm:$0xff]  ;;  %v2280_v42 = vld [vmem:[#allocation3 + $0x1f0] sm:$0xff] }
 0x5ba   :  { %2596 = vmatpush3.bf16.msra.mxu0 %v2222_v30  ;;  %v2270_v19 = vld [vmem:[#allocation3 + $0x1a0] sm:$0xff]  ;;  %v2271_v53 = vld [vmem:[#allocation3 + $0x1a8] sm:$0xff]  ;;  %v2256_v17 = vld [vmem:[#allocation3 + $0x130] sm:$0xff] }
 0x5bb   :  { %2618 = vmatpush3.bf16.msra.mxu1 %v2238_v32  ;;  %2597 = vmatprep.subr.bf16.mxu0 %v2231_v8  ;;  %v2272_v46 = vld [vmem:[#allocation3 + $0x1b0] sm:$0xff]  ;;  %v2265_v47 = vld [vmem:[#allocation3 + $0x178] sm:$0xff]  ;;  %v2579_v61 = vld [vmem:[#allocation13 + $0x2b] ss:$0 sm:$0xff] }
 0x5bc   :  { %2619 = vmatprep.subr.bf16.mxu1 %v2247_v0  ;;  %v2281_v48 = vld [vmem:[#allocation3 + $0x1f8] sm:$0xff] }
 0x5bd   :  { %v2257_v20 = vld [vmem:[#allocation3 + $0x138] sm:$0xff] }
 0x5be   :  { %2598 = vmatpush3.bf16.msra.mxu0 %v2223_v37  ;;  %v2273_v49 = vld [vmem:[#allocation3 + $0x1b8] sm:$0xff] }
 0x5bf   :  { %2620 = vmatpush3.bf16.msra.mxu1 %v2239_v7  ;;  %2599 = vmatprep.subr.bf16.mxu0 %v2232_v63 }
 0x5c0   :  { %2621 = vmatprep.subr.bf16.mxu1 %v2248_v45 }
 0x5c2   :  { %2600 = vmatpush3.bf16.msra.mxu0 %v2224_v33 }
 0x5c3   :  { %2622 = vmatpush3.bf16.msra.mxu1 %v2240_v2  ;;  %2601 = vmatprep.subr.bf16.mxu0 %v2233_v50 }
 0x5c4   :  { %2623 = vmatprep.subr.bf16.mxu1 %v2249_v3 }
 0x5c6   :  { %2602 = vmatpush3.bf16.msra.mxu0 %v2225_v21 }
 0x5c7   :  { %2624 = vmatpush3.bf16.msra.mxu1 %v2241_v6  ;;  %2631 = vmatprep.subr.bf16.mxu0 %v2258_v10 }
 0x5c8   :  { %2653 = vmatprep.subr.bf16.mxu1 %v2274_v12 }
 0x5c9   :  { %2329 = vmatmul.mubr.bf16.vlgmr.msra.gmra.mrb[16].mxu0 %v2282_v9 }
 0x5ca   :  { %2369 = vmatmul.mubr.bf16.vlgmr.msra.gmra.mrb[16].mxu1 %v2284_v38  ;;  %2632 = vmatpush3.bf16.msra.mxu0 %v2250_v5 }
 0x5cb   :  { %2654 = vmatpush3.bf16.msra.mxu1 %v2266_v14  ;;  %2633 = vmatprep.subr.bf16.mxu0 %v2259_v23 }
 0x5cc   :  { %2655 = vmatprep.subr.bf16.mxu1 %v2275_v16  ;;  %2408 = vmatprep.mubr.bf16.mxu0 %v2287_v18 }
 0x5cd   :  { %2448 = vmatprep.mubr.bf16.mxu1 %v2289_v22 }
 0x5ce   :  { %2634 = vmatpush3.bf16.msra.mxu0 %v2251_v24 }
 0x5cf   :  { %2656 = vmatpush3.bf16.msra.mxu1 %v2267_v34  ;;  %2635 = vmatprep.subr.bf16.mxu0 %v2260_v25 }
 0x5d0   :  { %2657 = vmatprep.subr.bf16.mxu1 %v2276_v36 }
 0x5d2   :  { %2636 = vmatpush3.bf16.msra.mxu0 %v2252_v26 }
 0x5d3   :  { %2658 = vmatpush3.bf16.msra.mxu1 %v2268_v40  ;;  %2637 = vmatprep.subr.bf16.mxu0 %v2261_v27 }
 0x5d4   :  { %2659 = vmatprep.subr.bf16.mxu1 %v2277_v56 }
 0x5d6   :  { %2638 = vmatpush3.bf16.msra.mxu0 %v2253_v29 }
 0x5d7   :  { %2660 = vmatpush3.bf16.msra.mxu1 %v2269_v55  ;;  %2639 = vmatprep.subr.bf16.mxu0 %v2262_v31 }
 0x5d8   :  { %2661 = vmatprep.subr.bf16.mxu1 %v2278_v57 }
 0x5da   :  { %2640 = vmatpush3.bf16.msra.mxu0 %v2254_v35 }
 0x5db   :  { %2662 = vmatpush3.bf16.msra.mxu1 %v2270_v19  ;;  %2641 = vmatprep.subr.bf16.mxu0 %v2263_v58 }
 0x5dc   :  { %2663 = vmatprep.subr.bf16.mxu1 %v2279_v39 }
 0x5de   :  { %2642 = vmatpush3.bf16.msra.mxu0 %v2255_v43 }
 0x5df   :  { %2664 = vmatpush3.bf16.msra.mxu1 %v2271_v53  ;;  %2643 = vmatprep.subr.bf16.mxu0 %v2264_v54 }
 0x5e0   :  { %2665 = vmatprep.subr.bf16.mxu1 %v2280_v42 }
 0x5e2   :  { %2644 = vmatpush3.bf16.msra.mxu0 %v2256_v17 }
 0x5e3   :  { %2666 = vmatpush3.bf16.msra.mxu1 %v2272_v46  ;;  %2645 = vmatprep.subr.bf16.mxu0 %v2265_v47 }
 0x5e4   :  { %2667 = vmatprep.subr.bf16.mxu1 %v2281_v48 }
 0x5e6   :  { %2646 = vmatpush3.bf16.msra.mxu0 %v2257_v20 }
 0x5e7   :  { %2668 = vmatpush3.bf16.msra.mxu1 %v2273_v49 }
 0x5e9   :  { %2409 = vmatmul.mubr.bf16.vlgmr.msra.gmra.mrb[20].mxu0 %v2286_v51 }
 0x5ea   :  { %2449 = vmatmul.mubr.bf16.vlgmr.msra.gmra.mrb[20].mxu1 %v2288_v52 }
 0x69c   :  { %v2603_v59 = vpop.f32.mrb[16].mxu0 }
 0x69d   :  { %v2625_v60 = vpop.f32.mrb[16].mxu1  ;;  %v2604_v62 = vpop.f32.mrb[17].mxu0 }
 0x69e   :  { %v2626_v1 = vpop.f32.mrb[17].mxu1  ;;  %v2605_v4 = vadd.f32 %v2604_v62, %v2603_v59  ;;  %v2606_v11 = vpop.f32.mrb[18].mxu0 }
 0x69f   :  { %v2627_v13 = vadd.f32 %v2626_v1, %v2625_v60  ;;  %v2628_v15 = vpop.f32.mrb[18].mxu1  ;;  %v2607_v28 = vpop.f32.mrb[19].mxu0 }
 0x6a0   :  { %v2629_v30 = vpop.f32.mrb[19].mxu1  ;;  %v2331_v32 = vadd.f32 %v2605_v4, %v2579_v61 }
 0x6a2   :  { %v2371_v41 = vadd.f32 %v2627_v13, %v2331_v32 }
 0x6bc   :  { %v2647_v8 = vpop.f32.mrb[20].mxu0 }
 0x6bd   :  { %v2669_v0 = vpop.f32.mrb[20].mxu1  ;;  %v2648_v44 = vpop.f32.mrb[21].mxu0 }
 0x6be   :  { %v2670_v37 = vpop.f32.mrb[21].mxu1  ;;  %v2649_v7 = vadd.f32 %v2648_v44, %v2647_v8  ;;  %v2650_v45 = vpop.f32.mrb[22].mxu0 }
 0x6bf   :  { %v2671_v63 = vadd.f32 %v2670_v37, %v2669_v0  ;;  %v2672_v33 = vpop.f32.mrb[22].mxu1  ;;  %v2651_v2 = vpop.f32.mrb[23].mxu0 }
 0x6c0   :  { %v2673_v50 = vpop.f32.mrb[23].mxu1  ;;  %v2411_v3 = vadd.f32 %v2649_v7, %v2371_v41 }
 0x6c2   :  { %v2451_v21 = vadd.f32 %v2671_v63, %v2411_v3 }
 0x6c4   :  { %v2456_v6 = vmul.f32 0.5, %v2451_v21 }
 0x6c6   :  { %2886 = vtanh.f32 %v2456_v6 }
 0x6d0   :  { %v2887_v10 = vpop.eup %2886 }
 0x6d1   :  { %v2458_v12 = vmul.f32 0.5, %v2887_v10 }
 0x6d3   :  { %v2459_v9 = vadd.f32 0.5, %v2458_v12 }
 0x6d5   :  { %2460 = vst [vmem:[#allocation14] sm:$0xff] %v2459_v9 }
 0x6d6   :  { %3031 = shalt.err (!%p3028_p10)
}
 0x6d7   :  { %s3032_s8 = scalar_lea.hbm %s3505_s7, 128 }
 0x6d8   :  { %p3033_p11 = scmp.ne.s32.totalorder %s3505_s7, %s3032_s8  ;;  %p3036_p12 = scmp.lt.u32.totalorder %s3032_s8, %s3505_s7 }
 0x6da   :  { %p3038_p13 = pnand %p3036_p12, %p3033_p11 }
 0x6dc   :  { %3041 = shalt.err (!%p3038_p13)
}
 0x6dd   :  { %2470 = dma.vmem_to_hbm [thread:$0]  %s2468_s18, 128, %s3505_s7, [#allocation7]  }
 0x6de   :  { %3052 = dma.done.wait [#allocation7], 128  }
 0x6df   :  { %3053 = vsyncadd [#allocation7], 4294967168 }
 0x6e0   :  { %2474 = vsyncpa [#allocation6], 1 }
 0x6e1   :  { %2475 = vsyncpa [#allocation9], 1 }
 0x6e2   :  { %2476 = vsyncpa [#allocation12], 1 }
 0x6e3   :  { %2477 = vsyncpa [#allocation7], 1 }
 0x6e4   :  { %2478 = vsyncmov [#allocation4] }
 0x6e7   :  { %s2479_s24 = vpop.sfrf %2478 }
 0x6e8   :  { %p2580_p0 = scmp.ne.s32.totalorder %s2479_s24, 0 }
 0x6ea   :  { %2483 = shalt.err (%p2580_p0)  }
 0x6eb   :  { %2485 = vsyncmov [#allocation4 + $0x1] }
 0x6ee   :  { %s2486_s1 = vpop.sfrf %2485 }
 0x6ef   :  { %p2581_p1 = scmp.ne.s32.totalorder %s2486_s1, 0 }
 0x6f1   :  { %2490 = shalt.err (%p2581_p1)  }

</bundles_post_ra>
